<compile_context>
chip_gen: v6e
topology: v6e:2x2x1
jax: 0.10.0
libtpu: 0.0.40
codegen_flags: <defaults>
</compile_context>

<pallas_src>
import functools

import jax
import jax.numpy as jnp
from jax.experimental import pallas as pl
from jax.experimental.pallas import tpu as pltpu

# ----------------------------- synthetic BERT config -------------------------
VOCAB = 100
TYPE_VOCAB = 2
MAX_POS = 64
HIDDEN = 32
NUM_HEADS = 2
HEAD_DIM = HIDDEN // NUM_HEADS
INTERMEDIATE = 64
NUM_LAYERS = 2
NUM_LABELS = 3
LN_EPS = 1e-12


def _vmem_spec():
    return pl.BlockSpec(memory_space=pltpu.MemorySpace.VMEM)


# ----------------------------- in-kernel helpers ------------------------------
def _layernorm(x, g, b):
    x = x.astype(jnp.float32)
    mean = jnp.mean(x, axis=-1, keepdims=True)
    xc = x - mean
    var = jnp.mean(xc * xc, axis=-1, keepdims=True)
    return xc * jax.lax.rsqrt(var + LN_EPS) * g + b


# ----------------------------- fused forward kernel ---------------------------
def _fused_forward_kernel(*refs, batch, seq, with_loss):
    if with_loss:
        (x_emb_ref, mask_ref,
         emb_g_ref, emb_b_ref,
         wqkv_ref, bqkv_ref, wo_ref, bo_ref, ln1g_ref, ln1b_ref,
         wi_ref, bi_ref, wo2_ref, bo2_ref, ln2g_ref, ln2b_ref,
         wc_ref, bc_ref, labels_ref,
         logits_ref, loss_ref, attn_scr) = refs
    else:
        (x_emb_ref, mask_ref,
         emb_g_ref, emb_b_ref,
         wqkv_ref, bqkv_ref, wo_ref, bo_ref, ln1g_ref, ln1b_ref,
         wi_ref, bi_ref, wo2_ref, bo2_ref, ln2g_ref, ln2b_ref,
         wc_ref, bc_ref,
         logits_ref, attn_scr) = refs
        labels_ref = None
        loss_ref = None

    f32 = jnp.float32

    # Embedding LayerNorm (embedding sum already fused into the gather by XLA).
    x = _layernorm(x_emb_ref[...], emb_g_ref[...], emb_b_ref[...])      # [B*S, H]

    mask = mask_ref[...].astype(f32)                                    # [B, S]
    neg_bias = (1.0 - mask) * jnp.float32(-1e9)                         # [B, S]
    scale = jnp.float32(1.0 / (HEAD_DIM ** 0.5))

    # ------------------------- encoder layers (unrolled) ---------------------
    for l in range(NUM_LAYERS):
        # Fused QKV projection: one [B*S, H] x [H, 3H] matmul.
        qkv = jnp.dot(x, wqkv_ref[l], preferred_element_type=f32) + bqkv_ref[l]
        wo_l = wo_ref[l]                                                # [H, H]

        # Per-(batch, head) attention with static slices; output projection is
        # folded in per-head (ctx @ wo_slice) so no concat/transpose is needed.
        for b in range(batch):
            r0 = b * seq
            bias_b = neg_bias[b:b + 1, :]                               # [1, S]
            attn_b = jnp.zeros((seq, HIDDEN), f32)
            for h in range(NUM_HEADS):
                c0 = h * HEAD_DIM
                qh = qkv[r0:r0 + seq, c0:c0 + HEAD_DIM]                 # [S, dH]
                kh = qkv[r0:r0 + seq, HIDDEN + c0:HIDDEN + c0 + HEAD_DIM]
                vh = qkv[r0:r0 + seq, 2 * HIDDEN + c0:2 * HIDDEN + c0 + HEAD_DIM]

                scores = jax.lax.dot_general(
                    qh, kh, (((1,), (1,)), ((), ())),
                    preferred_element_type=f32) * scale + bias_b        # [S, S]
                scores = scores - jnp.max(scores, axis=-1, keepdims=True)
                p = jnp.exp(scores)
                p = p * pl.reciprocal(jnp.sum(p, axis=-1, keepdims=True),
                                      approx=True)
                ctx = jnp.dot(p, vh, preferred_element_type=f32)        # [S, dH]
                attn_b = attn_b + jnp.dot(ctx, wo_l[c0:c0 + HEAD_DIM, :],
                                          preferred_element_type=f32)   # [S, H]
            attn_scr[r0:r0 + seq, :] = attn_b

        # Residual + LayerNorm 1 (all in-kernel, VMEM resident).
        attn_out = attn_scr[...] + bo_ref[l]
        x1 = _layernorm(attn_out + x, ln1g_ref[l], ln1b_ref[l])

        # Feed-forward + residual + LayerNorm 2.
        ff = jnp.dot(x1, wi_ref[l], preferred_element_type=f32) + bi_ref[l]
        # TODO(synk): HF BERT uses erf-based gelu; tanh approximation used here.
        ff = jax.nn.gelu(ff, approximate=True)
        ff = jnp.dot(ff, wo2_ref[l], preferred_element_type=f32) + bo2_ref[l]
        x = _layernorm(ff + x1, ln2g_ref[l], ln2b_ref[l])

    # ------------------- masked mean pooling + classifier --------------------
    # (last_hidden_state * mask.unsqueeze(-1)).sum(1) / mask.sum(1)
    # NOTE: like the PyTorch reference, an all-zero mask row would divide by 0.
    inv_den = 1.0 / jnp.sum(mask, axis=1, keepdims=True)                # [B, 1]
    for b in range(batch):
        r0 = b * seq
        num_b = jnp.dot(mask[b:b + 1, :], x[r0:r0 + seq, :],
                        preferred_element_type=f32)                     # [1, H]
        pooled_b = num_b * inv_den[b:b + 1, :]
        logits_b = jnp.dot(pooled_b, wc_ref[...],
                           preferred_element_type=f32) + bc_ref[...]    # [1, L]
        logits_ref[b:b + 1, :] = logits_b.astype(logits_ref.dtype)

    # ------------------------------ BCE loss ----------------------------------
    if with_loss:
        z = logits_ref[...]                                             # [B, L]
        y = labels_ref[...].astype(f32)
        per = jnp.maximum(z, 0.0) - z * y + jnp.log1p(jnp.exp(-jnp.abs(z)))
        m = jnp.mean(per, axis=1, keepdims=True)
        loss_ref[...] = jnp.mean(m, axis=0, keepdims=True)


# ----------------------------- parameter init --------------------------------
def init_params(key):
    def nrm(k, shape):
        return 0.02 * jax.random.normal(k, shape, dtype=jnp.float32)

    (k_word, k_pos, k_type, k_qkv, k_wo, k_wi, k_wo2, k_wc) = jax.random.split(key, 8)
    L, H, I = NUM_LAYERS, HIDDEN, INTERMEDIATE
    params = {
        "word_emb": nrm(k_word, (VOCAB, H)),
        "pos_emb": nrm(k_pos, (MAX_POS, H)),
        "type_emb": nrm(k_type, (TYPE_VOCAB, H)),
        "emb_ln_g": jnp.ones((1, H), jnp.float32),
        "emb_ln_b": jnp.zeros((1, H), jnp.float32),
        # Per-layer weights stacked on a leading layer axis; Q|K|V fused.
        "wqkv": nrm(k_qkv, (L, H, 3 * H)),
        "bqkv": jnp.zeros((L, 1, 3 * H), jnp.float32),
        "wo": nrm(k_wo, (L, H, H)),
        "bo": jnp.zeros((L, 1, H), jnp.float32),
        "ln1_g": jnp.ones((L, 1, H), jnp.float32),
        "ln1_b": jnp.zeros((L, 1, H), jnp.float32),
        "wi": nrm(k_wi, (L, H, I)),
        "bi": jnp.zeros((L, 1, I), jnp.float32),
        "wo2": nrm(k_wo2, (L, I, H)),
        "bo2": jnp.zeros((L, 1, H), jnp.float32),
        "ln2_g": jnp.ones((L, 1, H), jnp.float32),
        "ln2_b": jnp.zeros((L, 1, H), jnp.float32),
        "wc": nrm(k_wc, (H, NUM_LABELS)),
        "bc": jnp.zeros((1, NUM_LABELS), jnp.float32),
    }
    return params


# ----------------------------- forward pass -----------------------------------
def bert_multilabel_forward(params, input_ids, attention_mask, token_type_ids,
                            labels=None):
    B, S = input_ids.shape
    mask_f = attention_mask.astype(jnp.float32)

    # Embedding gathers stay in plain JAX (data-dependent gather); XLA fuses
    # the three lookups + add into one op that feeds the fused kernel.
    x_emb = (jnp.take(params["word_emb"], input_ids, axis=0)
             + params["pos_emb"][:S][None, :, :]
             + jnp.take(params["type_emb"], token_type_ids, axis=0))
    x_emb = x_emb.reshape(B * S, HIDDEN)

    with_loss = labels is not None

    inputs = [
        x_emb, mask_f,
        params["emb_ln_g"], params["emb_ln_b"],
        params["wqkv"], params["bqkv"], params["wo"], params["bo"],
        params["ln1_g"], params["ln1_b"],
        params["wi"], params["bi"], params["wo2"], params["bo2"],
        params["ln2_g"], params["ln2_b"],
        params["wc"], params["bc"],
    ]
    if with_loss:
        inputs.append(labels.astype(jnp.float32))

    logits_struct = jax.ShapeDtypeStruct((B, NUM_LABELS), jnp.float32)
    if with_loss:
        out_shape = (logits_struct, jax.ShapeDtypeStruct((1, 1), jnp.float32))
        out_specs = (_vmem_spec(), _vmem_spec())
    else:
        out_shape = logits_struct
        out_specs = _vmem_spec()

    kernel = functools.partial(_fused_forward_kernel,
                               batch=B, seq=S, with_loss=with_loss)

    result = pl.pallas_call(
        kernel,
        out_shape=out_shape,
        in_specs=[_vmem_spec() for _ in inputs],
        out_specs=out_specs,
        scratch_shapes=[pltpu.VMEM((B * S, HIDDEN), jnp.float32)],
    )(*inputs)

    if with_loss:
        logits, loss = result
        return {"logits": logits, "loss": loss[0, 0]}
    return {"logits": result}


# ----------------------------- main -------------------------------------------
if __name__ == "__main__":
    B, S = 2, 8
    key = jax.random.PRNGKey(0)
    k_param, k_ids, k_lab = jax.random.split(key, 3)

    params = init_params(k_param)

    input_ids = jax.random.randint(k_ids, (B, S), 0, VOCAB, dtype=jnp.int32)
    attention_mask = jnp.array(
        [[1, 1, 1, 1, 1, 1, 1, 1],
         [1, 1, 1, 1, 1, 0, 0, 0]], dtype=jnp.int32)
    token_type_ids = jnp.zeros((B, S), dtype=jnp.int32)
    labels = jax.random.bernoulli(k_lab, 0.5, (B, NUM_LABELS)).astype(jnp.float32)

    out = bert_multilabel_forward(params, input_ids, attention_mask,
                                  token_type_ids, labels=labels)
    logits = jax.block_until_ready(out["logits"])
    loss = jax.block_until_ready(out["loss"])
    assert logits.shape == (B, NUM_LABELS)
    assert loss.shape == ()
    print("KERNEL_OK")
</pallas_src>

<mosaic_0001>
module attributes {stable_mosaic.version = 11 : i64} {
  func.func @_fused_forward_kernel(%arg0: memref<16x32xf32, #tpu.memory_space<vmem>>, %arg1: memref<2x8xf32, #tpu.memory_space<vmem>>, %arg2: memref<1x32xf32, #tpu.memory_space<vmem>>, %arg3: memref<1x32xf32, #tpu.memory_space<vmem>>, %arg4: memref<2x32x96xf32, #tpu.memory_space<vmem>>, %arg5: memref<2x1x96xf32, #tpu.memory_space<vmem>>, %arg6: memref<2x32x32xf32, #tpu.memory_space<vmem>>, %arg7: memref<2x1x32xf32, #tpu.memory_space<vmem>>, %arg8: memref<2x1x32xf32, #tpu.memory_space<vmem>>, %arg9: memref<2x1x32xf32, #tpu.memory_space<vmem>>, %arg10: memref<2x32x64xf32, #tpu.memory_space<vmem>>, %arg11: memref<2x1x64xf32, #tpu.memory_space<vmem>>, %arg12: memref<2x64x32xf32, #tpu.memory_space<vmem>>, %arg13: memref<2x1x32xf32, #tpu.memory_space<vmem>>, %arg14: memref<2x1x32xf32, #tpu.memory_space<vmem>>, %arg15: memref<2x1x32xf32, #tpu.memory_space<vmem>>, %arg16: memref<32x3xf32, #tpu.memory_space<vmem>>, %arg17: memref<1x3xf32, #tpu.memory_space<vmem>>, %arg18: memref<2x3xf32, #tpu.memory_space<vmem>>, %arg19: memref<2x3xf32, #tpu.memory_space<vmem>>, %arg20: memref<1x1xf32, #tpu.memory_space<vmem>>, %arg21: memref<16x32xf32, #tpu.memory_space<vmem>>) attributes {dimension_semantics = [], scalar_prefetch = 0 : i64, scratch_operands = 1 : i64, tpu.core_type = #tpu.core_type<tc>} {
    %c0 = arith.constant 0 : index
    %c0_0 = arith.constant 0 : index
    %0 = vector.load %arg0[%c0, %c0_0] : memref<16x32xf32, #tpu.memory_space<vmem>>, vector<16x32xf32>
    %c0_1 = arith.constant 0 : index
    %c0_2 = arith.constant 0 : index
    %1 = vector.load %arg2[%c0_1, %c0_2] : memref<1x32xf32, #tpu.memory_space<vmem>>, vector<1x32xf32>
    %c0_3 = arith.constant 0 : index
    %c0_4 = arith.constant 0 : index
    %2 = vector.load %arg3[%c0_3, %c0_4] : memref<1x32xf32, #tpu.memory_space<vmem>>, vector<1x32xf32>
    %cst = arith.constant dense<0.000000e+00> : vector<16xf32>
    %3 = vector.multi_reduction <add>, %0, %cst [1] : vector<16x32xf32> to vector<16xf32>
    %4 = vector.shape_cast %3 : vector<16xf32> to vector<16x1xf32>
    %cst_5 = arith.constant 3.200000e+01 : f32
    %5 = vector.broadcast %cst_5 : f32 to vector<16x1xf32>
    %6 = arith.divf %4, %5 : vector<16x1xf32>
    %7 = vector.broadcast %6 : vector<16x1xf32> to vector<16x32xf32>
    %8 = arith.subf %0, %7 : vector<16x32xf32>
    %9 = arith.mulf %8, %8 : vector<16x32xf32>
    %cst_6 = arith.constant dense<0.000000e+00> : vector<16xf32>
    %10 = vector.multi_reduction <add>, %9, %cst_6 [1] : vector<16x32xf32> to vector<16xf32>
    %11 = vector.shape_cast %10 : vector<16xf32> to vector<16x1xf32>
    %cst_7 = arith.constant 3.200000e+01 : f32
    %12 = vector.broadcast %cst_7 : f32 to vector<16x1xf32>
    %13 = arith.divf %11, %12 : vector<16x1xf32>
    %cst_8 = arith.constant 9.99999996E-13 : f32
    %14 = vector.broadcast %cst_8 : f32 to vector<16x1xf32>
    %15 = arith.addf %13, %14 : vector<16x1xf32>
    %16 = math.rsqrt %15 : vector<16x1xf32>
    %17 = vector.broadcast %16 : vector<16x1xf32> to vector<16x32xf32>
    %18 = arith.mulf %8, %17 : vector<16x32xf32>
    %19 = vector.broadcast %1 : vector<1x32xf32> to vector<16x32xf32>
    %20 = arith.mulf %18, %19 : vector<16x32xf32>
    %21 = vector.broadcast %2 : vector<1x32xf32> to vector<16x32xf32>
    %22 = arith.addf %20, %21 : vector<16x32xf32>
    %c0_9 = arith.constant 0 : index
    %c0_10 = arith.constant 0 : index
    %23 = vector.load %arg1[%c0_9, %c0_10] : memref<2x8xf32, #tpu.memory_space<vmem>>, vector<2x8xf32>
    %cst_11 = arith.constant 1.000000e+00 : f32
    %24 = vector.broadcast %cst_11 : f32 to vector<2x8xf32>
    %25 = arith.subf %24, %23 : vector<2x8xf32>
    %cst_12 = arith.constant -1.000000e+09 : f32
    %26 = vector.broadcast %cst_12 : f32 to vector<2x8xf32>
    %27 = arith.mulf %25, %26 : vector<2x8xf32>
    %c0_13 = arith.constant 0 : index
    %c0_14 = arith.constant 0 : index
    %c0_15 = arith.constant 0 : index
    %28 = vector.load %arg4[%c0_13, %c0_14, %c0_15] : memref<2x32x96xf32, #tpu.memory_space<vmem>>, vector<1x32x96xf32>
    %29 = vector.shape_cast %28 : vector<1x32x96xf32> to vector<32x96xf32>
    %cst_16 = arith.constant dense<0.000000e+00> : vector<16x96xf32>
    %30 = tpu.matmul %22, %29, %cst_16 {dimension_numbers = #tpu.dot_dimension_numbers<[1], [0], [0], [1], [0, 0, 1, 1], [], []>} : vector<16x32xf32>, vector<32x96xf32>, vector<16x96xf32> -> vector<16x96xf32>
    %c0_17 = arith.constant 0 : index
    %c0_18 = arith.constant 0 : index
    %c0_19 = arith.constant 0 : index
    %31 = vector.load %arg5[%c0_17, %c0_18, %c0_19] : memref<2x1x96xf32, #tpu.memory_space<vmem>>, vector<1x1x96xf32>
    %32 = vector.shape_cast %31 : vector<1x1x96xf32> to vector<1x96xf32>
    %33 = vector.broadcast %32 : vector<1x96xf32> to vector<16x96xf32>
    %34 = arith.addf %30, %33 : vector<16x96xf32>
    %c0_20 = arith.constant 0 : index
    %c0_21 = arith.constant 0 : index
    %c0_22 = arith.constant 0 : index
    %35 = vector.load %arg6[%c0_20, %c0_21, %c0_22] : memref<2x32x32xf32, #tpu.memory_space<vmem>>, vector<1x32x32xf32>
    %36 = vector.shape_cast %35 : vector<1x32x32xf32> to vector<32x32xf32>
    %37 = vector.extract_strided_slice %27 {offsets = [0, 0], sizes = [1, 8], strides = [1, 1]} : vector<2x8xf32> to vector<1x8xf32>
    %cst_23 = arith.constant 0.000000e+00 : f32
    %38 = vector.broadcast %cst_23 : f32 to vector<8x32xf32>
    %39 = vector.extract_strided_slice %34 {offsets = [0, 0], sizes = [8, 16], strides = [1, 1]} : vector<16x96xf32> to vector<8x16xf32>
    %40 = vector.extract_strided_slice %34 {offsets = [0, 32], sizes = [8, 16], strides = [1, 1]} : vector<16x96xf32> to vector<8x16xf32>
    %41 = vector.extract_strided_slice %34 {offsets = [0, 64], sizes = [8, 16], strides = [1, 1]} : vector<16x96xf32> to vector<8x16xf32>
    %cst_24 = arith.constant dense<0.000000e+00> : vector<8x8xf32>
    %42 = tpu.matmul %39, %40, %cst_24 {dimension_numbers = #tpu.dot_dimension_numbers<[1], [1], [0], [0], [0, 0, 1, 0], [], []>} : vector<8x16xf32>, vector<8x16xf32>, vector<8x8xf32> -> vector<8x8xf32>
    %cst_25 = arith.constant 2.500000e-01 : f32
    %43 = vector.broadcast %cst_25 : f32 to vector<8x8xf32>
    %44 = arith.mulf %42, %43 : vector<8x8xf32>
    %45 = vector.broadcast %37 : vector<1x8xf32> to vector<8x8xf32>
    %46 = arith.addf %44, %45 : vector<8x8xf32>
    %cst_26 = arith.constant dense<0xFF800000> : vector<8xf32>
    %47 = vector.multi_reduction <maximumf>, %46, %cst_26 [1] : vector<8x8xf32> to vector<8xf32>
    %48 = vector.shape_cast %47 : vector<8xf32> to vector<8x1xf32>
    %49 = vector.broadcast %48 : vector<8x1xf32> to vector<8x8xf32>
    %50 = arith.subf %46, %49 : vector<8x8xf32>
    %51 = math.exp %50 : vector<8x8xf32>
    %cst_27 = arith.constant dense<0.000000e+00> : vector<8xf32>
    %52 = vector.multi_reduction <add>, %51, %cst_27 [1] : vector<8x8xf32> to vector<8xf32>
    %53 = vector.shape_cast %52 : vector<8xf32> to vector<8x1xf32>
    %54 = tpu.reciprocal %53 {approx = true} : vector<8x1xf32> -> vector<8x1xf32>
    %55 = vector.broadcast %54 : vector<8x1xf32> to vector<8x8xf32>
    %56 = arith.mulf %51, %55 : vector<8x8xf32>
    %cst_28 = arith.constant dense<0.000000e+00> : vector<8x16xf32>
    %57 = tpu.matmul %56, %41, %cst_28 {dimension_numbers = #tpu.dot_dimension_numbers<[1], [0], [0], [1], [0, 0, 1, 1], [], []>} : vector<8x8xf32>, vector<8x16xf32>, vector<8x16xf32> -> vector<8x16xf32>
    %58 = vector.extract_strided_slice %36 {offsets = [0, 0], sizes = [16, 32], strides = [1, 1]} : vector<32x32xf32> to vector<16x32xf32>
    %cst_29 = arith.constant dense<0.000000e+00> : vector<8x32xf32>
    %59 = tpu.matmul %57, %58, %cst_29 {dimension_numbers = #tpu.dot_dimension_numbers<[1], [0], [0], [1], [0, 0, 1, 1], [], []>} : vector<8x16xf32>, vector<16x32xf32>, vector<8x32xf32> -> vector<8x32xf32>
    %60 = arith.addf %38, %59 : vector<8x32xf32>
    %61 = vector.extract_strided_slice %34 {offsets = [0, 16], sizes = [8, 16], strides = [1, 1]} : vector<16x96xf32> to vector<8x16xf32>
    %62 = vector.extract_strided_slice %34 {offsets = [0, 48], sizes = [8, 16], strides = [1, 1]} : vector<16x96xf32> to vector<8x16xf32>
    %63 = vector.extract_strided_slice %34 {offsets = [0, 80], sizes = [8, 16], strides = [1, 1]} : vector<16x96xf32> to vector<8x16xf32>
    %cst_30 = arith.constant dense<0.000000e+00> : vector<8x8xf32>
    %64 = tpu.matmul %61, %62, %cst_30 {dimension_numbers = #tpu.dot_dimension_numbers<[1], [1], [0], [0], [0, 0, 1, 0], [], []>} : vector<8x16xf32>, vector<8x16xf32>, vector<8x8xf32> -> vector<8x8xf32>
    %cst_31 = arith.constant 2.500000e-01 : f32
    %65 = vector.broadcast %cst_31 : f32 to vector<8x8xf32>
    %66 = arith.mulf %64, %65 : vector<8x8xf32>
    %67 = vector.broadcast %37 : vector<1x8xf32> to vector<8x8xf32>
    %68 = arith.addf %66, %67 : vector<8x8xf32>
    %cst_32 = arith.constant dense<0xFF800000> : vector<8xf32>
    %69 = vector.multi_reduction <maximumf>, %68, %cst_32 [1] : vector<8x8xf32> to vector<8xf32>
    %70 = vector.shape_cast %69 : vector<8xf32> to vector<8x1xf32>
    %71 = vector.broadcast %70 : vector<8x1xf32> to vector<8x8xf32>
    %72 = arith.subf %68, %71 : vector<8x8xf32>
    %73 = math.exp %72 : vector<8x8xf32>
    %cst_33 = arith.constant dense<0.000000e+00> : vector<8xf32>
    %74 = vector.multi_reduction <add>, %73, %cst_33 [1] : vector<8x8xf32> to vector<8xf32>
    %75 = vector.shape_cast %74 : vector<8xf32> to vector<8x1xf32>
    %76 = tpu.reciprocal %75 {approx = true} : vector<8x1xf32> -> vector<8x1xf32>
    %77 = vector.broadcast %76 : vector<8x1xf32> to vector<8x8xf32>
    %78 = arith.mulf %73, %77 : vector<8x8xf32>
    %cst_34 = arith.constant dense<0.000000e+00> : vector<8x16xf32>
    %79 = tpu.matmul %78, %63, %cst_34 {dimension_numbers = #tpu.dot_dimension_numbers<[1], [0], [0], [1], [0, 0, 1, 1], [], []>} : vector<8x8xf32>, vector<8x16xf32>, vector<8x16xf32> -> vector<8x16xf32>
    %80 = vector.extract_strided_slice %36 {offsets = [16, 0], sizes = [16, 32], strides = [1, 1]} : vector<32x32xf32> to vector<16x32xf32>
    %cst_35 = arith.constant dense<0.000000e+00> : vector<8x32xf32>
    %81 = tpu.matmul %79, %80, %cst_35 {dimension_numbers = #tpu.dot_dimension_numbers<[1], [0], [0], [1], [0, 0, 1, 1], [], []>} : vector<8x16xf32>, vector<16x32xf32>, vector<8x32xf32> -> vector<8x32xf32>
    %82 = arith.addf %60, %81 : vector<8x32xf32>
    %c0_36 = arith.constant 0 : index
    %c0_37 = arith.constant 0 : index
    %83 = vector.load %arg21[%c0_36, %c0_37] : memref<16x32xf32, #tpu.memory_space<vmem>>, vector<8x32xf32>
    tpu.vector_store %arg21[%c0_36, %c0_37], %82 {strides = array<i32>} : memref<16x32xf32, #tpu.memory_space<vmem>>, vector<8x32xf32>,
    %84 = vector.extract_strided_slice %27 {offsets = [1, 0], sizes = [1, 8], strides = [1, 1]} : vector<2x8xf32> to vector<1x8xf32>
    %cst_38 = arith.constant 0.000000e+00 : f32
    %85 = vector.broadcast %cst_38 : f32 to vector<8x32xf32>
    %86 = vector.extract_strided_slice %34 {offsets = [8, 0], sizes = [8, 16], strides = [1, 1]} : vector<16x96xf32> to vector<8x16xf32>
    %87 = vector.extract_strided_slice %34 {offsets = [8, 32], sizes = [8, 16], strides = [1, 1]} : vector<16x96xf32> to vector<8x16xf32>
    %88 = vector.extract_strided_slice %34 {offsets = [8, 64], sizes = [8, 16], strides = [1, 1]} : vector<16x96xf32> to vector<8x16xf32>
    %cst_39 = arith.constant dense<0.000000e+00> : vector<8x8xf32>
    %89 = tpu.matmul %86, %87, %cst_39 {dimension_numbers = #tpu.dot_dimension_numbers<[1], [1], [0], [0], [0, 0, 1, 0], [], []>} : vector<8x16xf32>, vector<8x16xf32>, vector<8x8xf32> -> vector<8x8xf32>
    %cst_40 = arith.constant 2.500000e-01 : f32
    %90 = vector.broadcast %cst_40 : f32 to vector<8x8xf32>
    %91 = arith.mulf %89, %90 : vector<8x8xf32>
    %92 = vector.broadcast %84 : vector<1x8xf32> to vector<8x8xf32>
    %93 = arith.addf %91, %92 : vector<8x8xf32>
    %cst_41 = arith.constant dense<0xFF800000> : vector<8xf32>
    %94 = vector.multi_reduction <maximumf>, %93, %cst_41 [1] : vector<8x8xf32> to vector<8xf32>
    %95 = vector.shape_cast %94 : vector<8xf32> to vector<8x1xf32>
    %96 = vector.broadcast %95 : vector<8x1xf32> to vector<8x8xf32>
    %97 = arith.subf %93, %96 : vector<8x8xf32>
    %98 = math.exp %97 : vector<8x8xf32>
    %cst_42 = arith.constant dense<0.000000e+00> : vector<8xf32>
    %99 = vector.multi_reduction <add>, %98, %cst_42 [1] : vector<8x8xf32> to vector<8xf32>
    %100 = vector.shape_cast %99 : vector<8xf32> to vector<8x1xf32>
    %101 = tpu.reciprocal %100 {approx = true} : vector<8x1xf32> -> vector<8x1xf32>
    %102 = vector.broadcast %101 : vector<8x1xf32> to vector<8x8xf32>
    %103 = arith.mulf %98, %102 : vector<8x8xf32>
    %cst_43 = arith.constant dense<0.000000e+00> : vector<8x16xf32>
    %104 = tpu.matmul %103, %88, %cst_43 {dimension_numbers = #tpu.dot_dimension_numbers<[1], [0], [0], [1], [0, 0, 1, 1], [], []>} : vector<8x8xf32>, vector<8x16xf32>, vector<8x16xf32> -> vector<8x16xf32>
    %105 = vector.extract_strided_slice %36 {offsets = [0, 0], sizes = [16, 32], strides = [1, 1]} : vector<32x32xf32> to vector<16x32xf32>
    %cst_44 = arith.constant dense<0.000000e+00> : vector<8x32xf32>
    %106 = tpu.matmul %104, %105, %cst_44 {dimension_numbers = #tpu.dot_dimension_numbers<[1], [0], [0], [1], [0, 0, 1, 1], [], []>} : vector<8x16xf32>, vector<16x32xf32>, vector<8x32xf32> -> vector<8x32xf32>
    %107 = arith.addf %85, %106 : vector<8x32xf32>
    %108 = vector.extract_strided_slice %34 {offsets = [8, 16], sizes = [8, 16], strides = [1, 1]} : vector<16x96xf32> to vector<8x16xf32>
    %109 = vector.extract_strided_slice %34 {offsets = [8, 48], sizes = [8, 16], strides = [1, 1]} : vector<16x96xf32> to vector<8x16xf32>
    %110 = vector.extract_strided_slice %34 {offsets = [8, 80], sizes = [8, 16], strides = [1, 1]} : vector<16x96xf32> to vector<8x16xf32>
    %cst_45 = arith.constant dense<0.000000e+00> : vector<8x8xf32>
    %111 = tpu.matmul %108, %109, %cst_45 {dimension_numbers = #tpu.dot_dimension_numbers<[1], [1], [0], [0], [0, 0, 1, 0], [], []>} : vector<8x16xf32>, vector<8x16xf32>, vector<8x8xf32> -> vector<8x8xf32>
    %cst_46 = arith.constant 2.500000e-01 : f32
    %112 = vector.broadcast %cst_46 : f32 to vector<8x8xf32>
    %113 = arith.mulf %111, %112 : vector<8x8xf32>
    %114 = vector.broadcast %84 : vector<1x8xf32> to vector<8x8xf32>
    %115 = arith.addf %113, %114 : vector<8x8xf32>
    %cst_47 = arith.constant dense<0xFF800000> : vector<8xf32>
    %116 = vector.multi_reduction <maximumf>, %115, %cst_47 [1] : vector<8x8xf32> to vector<8xf32>
    %117 = vector.shape_cast %116 : vector<8xf32> to vector<8x1xf32>
    %118 = vector.broadcast %117 : vector<8x1xf32> to vector<8x8xf32>
    %119 = arith.subf %115, %118 : vector<8x8xf32>
    %120 = math.exp %119 : vector<8x8xf32>
    %cst_48 = arith.constant dense<0.000000e+00> : vector<8xf32>
    %121 = vector.multi_reduction <add>, %120, %cst_48 [1] : vector<8x8xf32> to vector<8xf32>
    %122 = vector.shape_cast %121 : vector<8xf32> to vector<8x1xf32>
    %123 = tpu.reciprocal %122 {approx = true} : vector<8x1xf32> -> vector<8x1xf32>
    %124 = vector.broadcast %123 : vector<8x1xf32> to vector<8x8xf32>
    %125 = arith.mulf %120, %124 : vector<8x8xf32>
    %cst_49 = arith.constant dense<0.000000e+00> : vector<8x16xf32>
    %126 = tpu.matmul %125, %110, %cst_49 {dimension_numbers = #tpu.dot_dimension_numbers<[1], [0], [0], [1], [0, 0, 1, 1], [], []>} : vector<8x8xf32>, vector<8x16xf32>, vector<8x16xf32> -> vector<8x16xf32>
    %127 = vector.extract_strided_slice %36 {offsets = [16, 0], sizes = [16, 32], strides = [1, 1]} : vector<32x32xf32> to vector<16x32xf32>
    %cst_50 = arith.constant dense<0.000000e+00> : vector<8x32xf32>
    %128 = tpu.matmul %126, %127, %cst_50 {dimension_numbers = #tpu.dot_dimension_numbers<[1], [0], [0], [1], [0, 0, 1, 1], [], []>} : vector<8x16xf32>, vector<16x32xf32>, vector<8x32xf32> -> vector<8x32xf32>
    %129 = arith.addf %107, %128 : vector<8x32xf32>
    %c8 = arith.constant 8 : index
    %c0_51 = arith.constant 0 : index
    %130 = vector.load %arg21[%c8, %c0_51] : memref<16x32xf32, #tpu.memory_space<vmem>>, vector<8x32xf32>
    tpu.vector_store %arg21[%c8, %c0_51], %129 {strides = array<i32>} : memref<16x32xf32, #tpu.memory_space<vmem>>, vector<8x32xf32>,
    %c0_52 = arith.constant 0 : index
    %c0_53 = arith.constant 0 : index
    %131 = vector.load %arg21[%c0_52, %c0_53] : memref<16x32xf32, #tpu.memory_space<vmem>>, vector<16x32xf32>
    %c0_54 = arith.constant 0 : index
    %c0_55 = arith.constant 0 : index
    %c0_56 = arith.constant 0 : index
    %132 = vector.load %arg7[%c0_54, %c0_55, %c0_56] : memref<2x1x32xf32, #tpu.memory_space<vmem>>, vector<1x1x32xf32>
    %133 = vector.shape_cast %132 : vector<1x1x32xf32> to vector<1x32xf32>
    %134 = vector.broadcast %133 : vector<1x32xf32> to vector<16x32xf32>
    %135 = arith.addf %131, %134 : vector<16x32xf32>
    %136 = arith.addf %135, %22 : vector<16x32xf32>
    %c0_57 = arith.constant 0 : index
    %c0_58 = arith.constant 0 : index
    %c0_59 = arith.constant 0 : index
    %137 = vector.load %arg8[%c0_57, %c0_58, %c0_59] : memref<2x1x32xf32, #tpu.memory_space<vmem>>, vector<1x1x32xf32>
    %138 = vector.shape_cast %137 : vector<1x1x32xf32> to vector<1x32xf32>
    %c0_60 = arith.constant 0 : index
    %c0_61 = arith.constant 0 : index
    %c0_62 = arith.constant 0 : index
    %139 = vector.load %arg9[%c0_60, %c0_61, %c0_62] : memref<2x1x32xf32, #tpu.memory_space<vmem>>, vector<1x1x32xf32>
    %140 = vector.shape_cast %139 : vector<1x1x32xf32> to vector<1x32xf32>
    %cst_63 = arith.constant dense<0.000000e+00> : vector<16xf32>
    %141 = vector.multi_reduction <add>, %136, %cst_63 [1] : vector<16x32xf32> to vector<16xf32>
    %142 = vector.shape_cast %141 : vector<16xf32> to vector<16x1xf32>
    %cst_64 = arith.constant 3.200000e+01 : f32
    %143 = vector.broadcast %cst_64 : f32 to vector<16x1xf32>
    %144 = arith.divf %142, %143 : vector<16x1xf32>
    %145 = vector.broadcast %144 : vector<16x1xf32> to vector<16x32xf32>
    %146 = arith.subf %136, %145 : vector<16x32xf32>
    %147 = arith.mulf %146, %146 : vector<16x32xf32>
    %cst_65 = arith.constant dense<0.000000e+00> : vector<16xf32>
    %148 = vector.multi_reduction <add>, %147, %cst_65 [1] : vector<16x32xf32> to vector<16xf32>
    %149 = vector.shape_cast %148 : vector<16xf32> to vector<16x1xf32>
    %cst_66 = arith.constant 3.200000e+01 : f32
    %150 = vector.broadcast %cst_66 : f32 to vector<16x1xf32>
    %151 = arith.divf %149, %150 : vector<16x1xf32>
    %cst_67 = arith.constant 9.99999996E-13 : f32
    %152 = vector.broadcast %cst_67 : f32 to vector<16x1xf32>
    %153 = arith.addf %151, %152 : vector<16x1xf32>
    %154 = math.rsqrt %153 : vector<16x1xf32>
    %155 = vector.broadcast %154 : vector<16x1xf32> to vector<16x32xf32>
    %156 = arith.mulf %146, %155 : vector<16x32xf32>
    %157 = vector.broadcast %138 : vector<1x32xf32> to vector<16x32xf32>
    %158 = arith.mulf %156, %157 : vector<16x32xf32>
    %159 = vector.broadcast %140 : vector<1x32xf32> to vector<16x32xf32>
    %160 = arith.addf %158, %159 : vector<16x32xf32>
    %c0_68 = arith.constant 0 : index
    %c0_69 = arith.constant 0 : index
    %c0_70 = arith.constant 0 : index
    %161 = vector.load %arg10[%c0_68, %c0_69, %c0_70] : memref<2x32x64xf32, #tpu.memory_space<vmem>>, vector<1x32x64xf32>
    %162 = vector.shape_cast %161 : vector<1x32x64xf32> to vector<32x64xf32>
    %cst_71 = arith.constant dense<0.000000e+00> : vector<16x64xf32>
    %163 = tpu.matmul %160, %162, %cst_71 {dimension_numbers = #tpu.dot_dimension_numbers<[1], [0], [0], [1], [0, 0, 1, 1], [], []>} : vector<16x32xf32>, vector<32x64xf32>, vector<16x64xf32> -> vector<16x64xf32>
    %c0_72 = arith.constant 0 : index
    %c0_73 = arith.constant 0 : index
    %c0_74 = arith.constant 0 : index
    %164 = vector.load %arg11[%c0_72, %c0_73, %c0_74] : memref<2x1x64xf32, #tpu.memory_space<vmem>>, vector<1x1x64xf32>
    %165 = vector.shape_cast %164 : vector<1x1x64xf32> to vector<1x64xf32>
    %166 = vector.broadcast %165 : vector<1x64xf32> to vector<16x64xf32>
    %167 = arith.addf %163, %166 : vector<16x64xf32>
    %168 = arith.mulf %167, %167 : vector<16x64xf32>
    %169 = arith.mulf %167, %168 : vector<16x64xf32>
    %cst_75 = arith.constant 4.471500e-02 : f32
    %170 = vector.broadcast %cst_75 : f32 to vector<16x64xf32>
    %171 = arith.mulf %170, %169 : vector<16x64xf32>
    %172 = arith.addf %167, %171 : vector<16x64xf32>
    %cst_76 = arith.constant 0.797884583 : f32
    %173 = vector.broadcast %cst_76 : f32 to vector<16x64xf32>
    %174 = arith.mulf %173, %172 : vector<16x64xf32>
    %175 = math.tanh %174 : vector<16x64xf32>
    %cst_77 = arith.constant 1.000000e+00 : f32
    %176 = vector.broadcast %cst_77 : f32 to vector<16x64xf32>
    %177 = arith.addf %176, %175 : vector<16x64xf32>
    %cst_78 = arith.constant 5.000000e-01 : f32
    %178 = vector.broadcast %cst_78 : f32 to vector<16x64xf32>
    %179 = arith.mulf %178, %177 : vector<16x64xf32>
    %180 = arith.mulf %167, %179 : vector<16x64xf32>
    %c0_79 = arith.constant 0 : index
    %c0_80 = arith.constant 0 : index
    %c0_81 = arith.constant 0 : index
    %181 = vector.load %arg12[%c0_79, %c0_80, %c0_81] : memref<2x64x32xf32, #tpu.memory_space<vmem>>, vector<1x64x32xf32>
    %182 = vector.shape_cast %181 : vector<1x64x32xf32> to vector<64x32xf32>
    %cst_82 = arith.constant dense<0.000000e+00> : vector<16x32xf32>
    %183 = tpu.matmul %180, %182, %cst_82 {dimension_numbers = #tpu.dot_dimension_numbers<[1], [0], [0], [1], [0, 0, 1, 1], [], []>} : vector<16x64xf32>, vector<64x32xf32>, vector<16x32xf32> -> vector<16x32xf32>
    %c0_83 = arith.constant 0 : index
    %c0_84 = arith.constant 0 : index
    %c0_85 = arith.constant 0 : index
    %184 = vector.load %arg13[%c0_83, %c0_84, %c0_85] : memref<2x1x32xf32, #tpu.memory_space<vmem>>, vector<1x1x32xf32>
    %185 = vector.shape_cast %184 : vector<1x1x32xf32> to vector<1x32xf32>
    %186 = vector.broadcast %185 : vector<1x32xf32> to vector<16x32xf32>
    %187 = arith.addf %183, %186 : vector<16x32xf32>
    %188 = arith.addf %187, %160 : vector<16x32xf32>
    %c0_86 = arith.constant 0 : index
    %c0_87 = arith.constant 0 : index
    %c0_88 = arith.constant 0 : index
    %189 = vector.load %arg14[%c0_86, %c0_87, %c0_88] : memref<2x1x32xf32, #tpu.memory_space<vmem>>, vector<1x1x32xf32>
    %190 = vector.shape_cast %189 : vector<1x1x32xf32> to vector<1x32xf32>
    %c0_89 = arith.constant 0 : index
    %c0_90 = arith.constant 0 : index
    %c0_91 = arith.constant 0 : index
    %191 = vector.load %arg15[%c0_89, %c0_90, %c0_91] : memref<2x1x32xf32, #tpu.memory_space<vmem>>, vector<1x1x32xf32>
    %192 = vector.shape_cast %191 : vector<1x1x32xf32> to vector<1x32xf32>
    %cst_92 = arith.constant dense<0.000000e+00> : vector<16xf32>
    %193 = vector.multi_reduction <add>, %188, %cst_92 [1] : vector<16x32xf32> to vector<16xf32>
    %194 = vector.shape_cast %193 : vector<16xf32> to vector<16x1xf32>
    %cst_93 = arith.constant 3.200000e+01 : f32
    %195 = vector.broadcast %cst_93 : f32 to vector<16x1xf32>
    %196 = arith.divf %194, %195 : vector<16x1xf32>
    %197 = vector.broadcast %196 : vector<16x1xf32> to vector<16x32xf32>
    %198 = arith.subf %188, %197 : vector<16x32xf32>
    %199 = arith.mulf %198, %198 : vector<16x32xf32>
    %cst_94 = arith.constant dense<0.000000e+00> : vector<16xf32>
    %200 = vector.multi_reduction <add>, %199, %cst_94 [1] : vector<16x32xf32> to vector<16xf32>
    %201 = vector.shape_cast %200 : vector<16xf32> to vector<16x1xf32>
    %cst_95 = arith.constant 3.200000e+01 : f32
    %202 = vector.broadcast %cst_95 : f32 to vector<16x1xf32>
    %203 = arith.divf %201, %202 : vector<16x1xf32>
    %cst_96 = arith.constant 9.99999996E-13 : f32
    %204 = vector.broadcast %cst_96 : f32 to vector<16x1xf32>
    %205 = arith.addf %203, %204 : vector<16x1xf32>
    %206 = math.rsqrt %205 : vector<16x1xf32>
    %207 = vector.broadcast %206 : vector<16x1xf32> to vector<16x32xf32>
    %208 = arith.mulf %198, %207 : vector<16x32xf32>
    %209 = vector.broadcast %190 : vector<1x32xf32> to vector<16x32xf32>
    %210 = arith.mulf %208, %209 : vector<16x32xf32>
    %211 = vector.broadcast %192 : vector<1x32xf32> to vector<16x32xf32>
    %212 = arith.addf %210, %211 : vector<16x32xf32>
    %c1 = arith.constant 1 : index
    %c0_97 = arith.constant 0 : index
    %c0_98 = arith.constant 0 : index
    %213 = vector.load %arg4[%c1, %c0_97, %c0_98] : memref<2x32x96xf32, #tpu.memory_space<vmem>>, vector<1x32x96xf32>
    %214 = vector.shape_cast %213 : vector<1x32x96xf32> to vector<32x96xf32>
    %cst_99 = arith.constant dense<0.000000e+00> : vector<16x96xf32>
    %215 = tpu.matmul %212, %214, %cst_99 {dimension_numbers = #tpu.dot_dimension_numbers<[1], [0], [0], [1], [0, 0, 1, 1], [], []>} : vector<16x32xf32>, vector<32x96xf32>, vector<16x96xf32> -> vector<16x96xf32>
    %c1_100 = arith.constant 1 : index
    %c0_101 = arith.constant 0 : index
    %c0_102 = arith.constant 0 : index
    %216 = vector.load %arg5[%c1_100, %c0_101, %c0_102] : memref<2x1x96xf32, #tpu.memory_space<vmem>>, vector<1x1x96xf32>
    %217 = vector.shape_cast %216 : vector<1x1x96xf32> to vector<1x96xf32>
    %218 = vector.broadcast %217 : vector<1x96xf32> to vector<16x96xf32>
    %219 = arith.addf %215, %218 : vector<16x96xf32>
    %c1_103 = arith.constant 1 : index
    %c0_104 = arith.constant 0 : index
    %c0_105 = arith.constant 0 : index
    %220 = vector.load %arg6[%c1_103, %c0_104, %c0_105] : memref<2x32x32xf32, #tpu.memory_space<vmem>>, vector<1x32x32xf32>
    %221 = vector.shape_cast %220 : vector<1x32x32xf32> to vector<32x32xf32>
    %222 = vector.extract_strided_slice %27 {offsets = [0, 0], sizes = [1, 8], strides = [1, 1]} : vector<2x8xf32> to vector<1x8xf32>
    %cst_106 = arith.constant 0.000000e+00 : f32
    %223 = vector.broadcast %cst_106 : f32 to vector<8x32xf32>
    %224 = vector.extract_strided_slice %219 {offsets = [0, 0], sizes = [8, 16], strides = [1, 1]} : vector<16x96xf32> to vector<8x16xf32>
    %225 = vector.extract_strided_slice %219 {offsets = [0, 32], sizes = [8, 16], strides = [1, 1]} : vector<16x96xf32> to vector<8x16xf32>
    %226 = vector.extract_strided_slice %219 {offsets = [0, 64], sizes = [8, 16], strides = [1, 1]} : vector<16x96xf32> to vector<8x16xf32>
    %cst_107 = arith.constant dense<0.000000e+00> : vector<8x8xf32>
    %227 = tpu.matmul %224, %225, %cst_107 {dimension_numbers = #tpu.dot_dimension_numbers<[1], [1], [0], [0], [0, 0, 1, 0], [], []>} : vector<8x16xf32>, vector<8x16xf32>, vector<8x8xf32> -> vector<8x8xf32>
    %cst_108 = arith.constant 2.500000e-01 : f32
    %228 = vector.broadcast %cst_108 : f32 to vector<8x8xf32>
    %229 = arith.mulf %227, %228 : vector<8x8xf32>
    %230 = vector.broadcast %222 : vector<1x8xf32> to vector<8x8xf32>
    %231 = arith.addf %229, %230 : vector<8x8xf32>
    %cst_109 = arith.constant dense<0xFF800000> : vector<8xf32>
    %232 = vector.multi_reduction <maximumf>, %231, %cst_109 [1] : vector<8x8xf32> to vector<8xf32>
    %233 = vector.shape_cast %232 : vector<8xf32> to vector<8x1xf32>
    %234 = vector.broadcast %233 : vector<8x1xf32> to vector<8x8xf32>
    %235 = arith.subf %231, %234 : vector<8x8xf32>
    %236 = math.exp %235 : vector<8x8xf32>
    %cst_110 = arith.constant dense<0.000000e+00> : vector<8xf32>
    %237 = vector.multi_reduction <add>, %236, %cst_110 [1] : vector<8x8xf32> to vector<8xf32>
    %238 = vector.shape_cast %237 : vector<8xf32> to vector<8x1xf32>
    %239 = tpu.reciprocal %238 {approx = true} : vector<8x1xf32> -> vector<8x1xf32>
    %240 = vector.broadcast %239 : vector<8x1xf32> to vector<8x8xf32>
    %241 = arith.mulf %236, %240 : vector<8x8xf32>
    %cst_111 = arith.constant dense<0.000000e+00> : vector<8x16xf32>
    %242 = tpu.matmul %241, %226, %cst_111 {dimension_numbers = #tpu.dot_dimension_numbers<[1], [0], [0], [1], [0, 0, 1, 1], [], []>} : vector<8x8xf32>, vector<8x16xf32>, vector<8x16xf32> -> vector<8x16xf32>
    %243 = vector.extract_strided_slice %221 {offsets = [0, 0], sizes = [16, 32], strides = [1, 1]} : vector<32x32xf32> to vector<16x32xf32>
    %cst_112 = arith.constant dense<0.000000e+00> : vector<8x32xf32>
    %244 = tpu.matmul %242, %243, %cst_112 {dimension_numbers = #tpu.dot_dimension_numbers<[1], [0], [0], [1], [0, 0, 1, 1], [], []>} : vector<8x16xf32>, vector<16x32xf32>, vector<8x32xf32> -> vector<8x32xf32>
    %245 = arith.addf %223, %244 : vector<8x32xf32>
    %246 = vector.extract_strided_slice %219 {offsets = [0, 16], sizes = [8, 16], strides = [1, 1]} : vector<16x96xf32> to vector<8x16xf32>
    %247 = vector.extract_strided_slice %219 {offsets = [0, 48], sizes = [8, 16], strides = [1, 1]} : vector<16x96xf32> to vector<8x16xf32>
    %248 = vector.extract_strided_slice %219 {offsets = [0, 80], sizes = [8, 16], strides = [1, 1]} : vector<16x96xf32> to vector<8x16xf32>
    %cst_113 = arith.constant dense<0.000000e+00> : vector<8x8xf32>
    %249 = tpu.matmul %246, %247, %cst_113 {dimension_numbers = #tpu.dot_dimension_numbers<[1], [1], [0], [0], [0, 0, 1, 0], [], []>} : vector<8x16xf32>, vector<8x16xf32>, vector<8x8xf32> -> vector<8x8xf32>
    %cst_114 = arith.constant 2.500000e-01 : f32
    %250 = vector.broadcast %cst_114 : f32 to vector<8x8xf32>
    %251 = arith.mulf %249, %250 : vector<8x8xf32>
    %252 = vector.broadcast %222 : vector<1x8xf32> to vector<8x8xf32>
    %253 = arith.addf %251, %252 : vector<8x8xf32>
    %cst_115 = arith.constant dense<0xFF800000> : vector<8xf32>
    %254 = vector.multi_reduction <maximumf>, %253, %cst_115 [1] : vector<8x8xf32> to vector<8xf32>
    %255 = vector.shape_cast %254 : vector<8xf32> to vector<8x1xf32>
    %256 = vector.broadcast %255 : vector<8x1xf32> to vector<8x8xf32>
    %257 = arith.subf %253, %256 : vector<8x8xf32>
    %258 = math.exp %257 : vector<8x8xf32>
    %cst_116 = arith.constant dense<0.000000e+00> : vector<8xf32>
    %259 = vector.multi_reduction <add>, %258, %cst_116 [1] : vector<8x8xf32> to vector<8xf32>
    %260 = vector.shape_cast %259 : vector<8xf32> to vector<8x1xf32>
    %261 = tpu.reciprocal %260 {approx = true} : vector<8x1xf32> -> vector<8x1xf32>
    %262 = vector.broadcast %261 : vector<8x1xf32> to vector<8x8xf32>
    %263 = arith.mulf %258, %262 : vector<8x8xf32>
    %cst_117 = arith.constant dense<0.000000e+00> : vector<8x16xf32>
    %264 = tpu.matmul %263, %248, %cst_117 {dimension_numbers = #tpu.dot_dimension_numbers<[1], [0], [0], [1], [0, 0, 1, 1], [], []>} : vector<8x8xf32>, vector<8x16xf32>, vector<8x16xf32> -> vector<8x16xf32>
    %265 = vector.extract_strided_slice %221 {offsets = [16, 0], sizes = [16, 32], strides = [1, 1]} : vector<32x32xf32> to vector<16x32xf32>
    %cst_118 = arith.constant dense<0.000000e+00> : vector<8x32xf32>
    %266 = tpu.matmul %264, %265, %cst_118 {dimension_numbers = #tpu.dot_dimension_numbers<[1], [0], [0], [1], [0, 0, 1, 1], [], []>} : vector<8x16xf32>, vector<16x32xf32>, vector<8x32xf32> -> vector<8x32xf32>
    %267 = arith.addf %245, %266 : vector<8x32xf32>
    %c0_119 = arith.constant 0 : index
    %c0_120 = arith.constant 0 : index
    %268 = vector.load %arg21[%c0_119, %c0_120] : memref<16x32xf32, #tpu.memory_space<vmem>>, vector<8x32xf32>
    tpu.vector_store %arg21[%c0_119, %c0_120], %267 {strides = array<i32>} : memref<16x32xf32, #tpu.memory_space<vmem>>, vector<8x32xf32>,
    %269 = vector.extract_strided_slice %27 {offsets = [1, 0], sizes = [1, 8], strides = [1, 1]} : vector<2x8xf32> to vector<1x8xf32>
    %cst_121 = arith.constant 0.000000e+00 : f32
    %270 = vector.broadcast %cst_121 : f32 to vector<8x32xf32>
    %271 = vector.extract_strided_slice %219 {offsets = [8, 0], sizes = [8, 16], strides = [1, 1]} : vector<16x96xf32> to vector<8x16xf32>
    %272 = vector.extract_strided_slice %219 {offsets = [8, 32], sizes = [8, 16], strides = [1, 1]} : vector<16x96xf32> to vector<8x16xf32>
    %273 = vector.extract_strided_slice %219 {offsets = [8, 64], sizes = [8, 16], strides = [1, 1]} : vector<16x96xf32> to vector<8x16xf32>
    %cst_122 = arith.constant dense<0.000000e+00> : vector<8x8xf32>
    %274 = tpu.matmul %271, %272, %cst_122 {dimension_numbers = #tpu.dot_dimension_numbers<[1], [1], [0], [0], [0, 0, 1, 0], [], []>} : vector<8x16xf32>, vector<8x16xf32>, vector<8x8xf32> -> vector<8x8xf32>
    %cst_123 = arith.constant 2.500000e-01 : f32
    %275 = vector.broadcast %cst_123 : f32 to vector<8x8xf32>
    %276 = arith.mulf %274, %275 : vector<8x8xf32>
    %277 = vector.broadcast %269 : vector<1x8xf32> to vector<8x8xf32>
    %278 = arith.addf %276, %277 : vector<8x8xf32>
    %cst_124 = arith.constant dense<0xFF800000> : vector<8xf32>
    %279 = vector.multi_reduction <maximumf>, %278, %cst_124 [1] : vector<8x8xf32> to vector<8xf32>
    %280 = vector.shape_cast %279 : vector<8xf32> to vector<8x1xf32>
    %281 = vector.broadcast %280 : vector<8x1xf32> to vector<8x8xf32>
    %282 = arith.subf %278, %281 : vector<8x8xf32>
    %283 = math.exp %282 : vector<8x8xf32>
    %cst_125 = arith.constant dense<0.000000e+00> : vector<8xf32>
    %284 = vector.multi_reduction <add>, %283, %cst_125 [1] : vector<8x8xf32> to vector<8xf32>
    %285 = vector.shape_cast %284 : vector<8xf32> to vector<8x1xf32>
    %286 = tpu.reciprocal %285 {approx = true} : vector<8x1xf32> -> vector<8x1xf32>
    %287 = vector.broadcast %286 : vector<8x1xf32> to vector<8x8xf32>
    %288 = arith.mulf %283, %287 : vector<8x8xf32>
    %cst_126 = arith.constant dense<0.000000e+00> : vector<8x16xf32>
    %289 = tpu.matmul %288, %273, %cst_126 {dimension_numbers = #tpu.dot_dimension_numbers<[1], [0], [0], [1], [0, 0, 1, 1], [], []>} : vector<8x8xf32>, vector<8x16xf32>, vector<8x16xf32> -> vector<8x16xf32>
    %290 = vector.extract_strided_slice %221 {offsets = [0, 0], sizes = [16, 32], strides = [1, 1]} : vector<32x32xf32> to vector<16x32xf32>
    %cst_127 = arith.constant dense<0.000000e+00> : vector<8x32xf32>
    %291 = tpu.matmul %289, %290, %cst_127 {dimension_numbers = #tpu.dot_dimension_numbers<[1], [0], [0], [1], [0, 0, 1, 1], [], []>} : vector<8x16xf32>, vector<16x32xf32>, vector<8x32xf32> -> vector<8x32xf32>
    %292 = arith.addf %270, %291 : vector<8x32xf32>
    %293 = vector.extract_strided_slice %219 {offsets = [8, 16], sizes = [8, 16], strides = [1, 1]} : vector<16x96xf32> to vector<8x16xf32>
    %294 = vector.extract_strided_slice %219 {offsets = [8, 48], sizes = [8, 16], strides = [1, 1]} : vector<16x96xf32> to vector<8x16xf32>
    %295 = vector.extract_strided_slice %219 {offsets = [8, 80], sizes = [8, 16], strides = [1, 1]} : vector<16x96xf32> to vector<8x16xf32>
    %cst_128 = arith.constant dense<0.000000e+00> : vector<8x8xf32>
    %296 = tpu.matmul %293, %294, %cst_128 {dimension_numbers = #tpu.dot_dimension_numbers<[1], [1], [0], [0], [0, 0, 1, 0], [], []>} : vector<8x16xf32>, vector<8x16xf32>, vector<8x8xf32> -> vector<8x8xf32>
    %cst_129 = arith.constant 2.500000e-01 : f32
    %297 = vector.broadcast %cst_129 : f32 to vector<8x8xf32>
    %298 = arith.mulf %296, %297 : vector<8x8xf32>
    %299 = vector.broadcast %269 : vector<1x8xf32> to vector<8x8xf32>
    %300 = arith.addf %298, %299 : vector<8x8xf32>
    %cst_130 = arith.constant dense<0xFF800000> : vector<8xf32>
    %301 = vector.multi_reduction <maximumf>, %300, %cst_130 [1] : vector<8x8xf32> to vector<8xf32>
    %302 = vector.shape_cast %301 : vector<8xf32> to vector<8x1xf32>
    %303 = vector.broadcast %302 : vector<8x1xf32> to vector<8x8xf32>
    %304 = arith.subf %300, %303 : vector<8x8xf32>
    %305 = math.exp %304 : vector<8x8xf32>
    %cst_131 = arith.constant dense<0.000000e+00> : vector<8xf32>
    %306 = vector.multi_reduction <add>, %305, %cst_131 [1] : vector<8x8xf32> to vector<8xf32>
    %307 = vector.shape_cast %306 : vector<8xf32> to vector<8x1xf32>
    %308 = tpu.reciprocal %307 {approx = true} : vector<8x1xf32> -> vector<8x1xf32>
    %309 = vector.broadcast %308 : vector<8x1xf32> to vector<8x8xf32>
    %310 = arith.mulf %305, %309 : vector<8x8xf32>
    %cst_132 = arith.constant dense<0.000000e+00> : vector<8x16xf32>
    %311 = tpu.matmul %310, %295, %cst_132 {dimension_numbers = #tpu.dot_dimension_numbers<[1], [0], [0], [1], [0, 0, 1, 1], [], []>} : vector<8x8xf32>, vector<8x16xf32>, vector<8x16xf32> -> vector<8x16xf32>
    %312 = vector.extract_strided_slice %221 {offsets = [16, 0], sizes = [16, 32], strides = [1, 1]} : vector<32x32xf32> to vector<16x32xf32>
    %cst_133 = arith.constant dense<0.000000e+00> : vector<8x32xf32>
    %313 = tpu.matmul %311, %312, %cst_133 {dimension_numbers = #tpu.dot_dimension_numbers<[1], [0], [0], [1], [0, 0, 1, 1], [], []>} : vector<8x16xf32>, vector<16x32xf32>, vector<8x32xf32> -> vector<8x32xf32>
    %314 = arith.addf %292, %313 : vector<8x32xf32>
    %c8_134 = arith.constant 8 : index
    %c0_135 = arith.constant 0 : index
    %315 = vector.load %arg21[%c8_134, %c0_135] : memref<16x32xf32, #tpu.memory_space<vmem>>, vector<8x32xf32>
    tpu.vector_store %arg21[%c8_134, %c0_135], %314 {strides = array<i32>} : memref<16x32xf32, #tpu.memory_space<vmem>>, vector<8x32xf32>,
    %c0_136 = arith.constant 0 : index
    %c0_137 = arith.constant 0 : index
    %316 = vector.load %arg21[%c0_136, %c0_137] : memref<16x32xf32, #tpu.memory_space<vmem>>, vector<16x32xf32>
    %c1_138 = arith.constant 1 : index
    %c0_139 = arith.constant 0 : index
    %c0_140 = arith.constant 0 : index
    %317 = vector.load %arg7[%c1_138, %c0_139, %c0_140] : memref<2x1x32xf32, #tpu.memory_space<vmem>>, vector<1x1x32xf32>
    %318 = vector.shape_cast %317 : vector<1x1x32xf32> to vector<1x32xf32>
    %319 = vector.broadcast %318 : vector<1x32xf32> to vector<16x32xf32>
    %320 = arith.addf %316, %319 : vector<16x32xf32>
    %321 = arith.addf %320, %212 : vector<16x32xf32>
    %c1_141 = arith.constant 1 : index
    %c0_142 = arith.constant 0 : index
    %c0_143 = arith.constant 0 : index
    %322 = vector.load %arg8[%c1_141, %c0_142, %c0_143] : memref<2x1x32xf32, #tpu.memory_space<vmem>>, vector<1x1x32xf32>
    %323 = vector.shape_cast %322 : vector<1x1x32xf32> to vector<1x32xf32>
    %c1_144 = arith.constant 1 : index
    %c0_145 = arith.constant 0 : index
    %c0_146 = arith.constant 0 : index
    %324 = vector.load %arg9[%c1_144, %c0_145, %c0_146] : memref<2x1x32xf32, #tpu.memory_space<vmem>>, vector<1x1x32xf32>
    %325 = vector.shape_cast %324 : vector<1x1x32xf32> to vector<1x32xf32>
    %cst_147 = arith.constant dense<0.000000e+00> : vector<16xf32>
    %326 = vector.multi_reduction <add>, %321, %cst_147 [1] : vector<16x32xf32> to vector<16xf32>
    %327 = vector.shape_cast %326 : vector<16xf32> to vector<16x1xf32>
    %cst_148 = arith.constant 3.200000e+01 : f32
    %328 = vector.broadcast %cst_148 : f32 to vector<16x1xf32>
    %329 = arith.divf %327, %328 : vector<16x1xf32>
    %330 = vector.broadcast %329 : vector<16x1xf32> to vector<16x32xf32>
    %331 = arith.subf %321, %330 : vector<16x32xf32>
    %332 = arith.mulf %331, %331 : vector<16x32xf32>
    %cst_149 = arith.constant dense<0.000000e+00> : vector<16xf32>
    %333 = vector.multi_reduction <add>, %332, %cst_149 [1] : vector<16x32xf32> to vector<16xf32>
    %334 = vector.shape_cast %333 : vector<16xf32> to vector<16x1xf32>
    %cst_150 = arith.constant 3.200000e+01 : f32
    %335 = vector.broadcast %cst_150 : f32 to vector<16x1xf32>
    %336 = arith.divf %334, %335 : vector<16x1xf32>
    %cst_151 = arith.constant 9.99999996E-13 : f32
    %337 = vector.broadcast %cst_151 : f32 to vector<16x1xf32>
    %338 = arith.addf %336, %337 : vector<16x1xf32>
    %339 = math.rsqrt %338 : vector<16x1xf32>
    %340 = vector.broadcast %339 : vector<16x1xf32> to vector<16x32xf32>
    %341 = arith.mulf %331, %340 : vector<16x32xf32>
    %342 = vector.broadcast %323 : vector<1x32xf32> to vector<16x32xf32>
    %343 = arith.mulf %341, %342 : vector<16x32xf32>
    %344 = vector.broadcast %325 : vector<1x32xf32> to vector<16x32xf32>
    %345 = arith.addf %343, %344 : vector<16x32xf32>
    %c1_152 = arith.constant 1 : index
    %c0_153 = arith.constant 0 : index
    %c0_154 = arith.constant 0 : index
    %346 = vector.load %arg10[%c1_152, %c0_153, %c0_154] : memref<2x32x64xf32, #tpu.memory_space<vmem>>, vector<1x32x64xf32>
    %347 = vector.shape_cast %346 : vector<1x32x64xf32> to vector<32x64xf32>
    %cst_155 = arith.constant dense<0.000000e+00> : vector<16x64xf32>
    %348 = tpu.matmul %345, %347, %cst_155 {dimension_numbers = #tpu.dot_dimension_numbers<[1], [0], [0], [1], [0, 0, 1, 1], [], []>} : vector<16x32xf32>, vector<32x64xf32>, vector<16x64xf32> -> vector<16x64xf32>
    %c1_156 = arith.constant 1 : index
    %c0_157 = arith.constant 0 : index
    %c0_158 = arith.constant 0 : index
    %349 = vector.load %arg11[%c1_156, %c0_157, %c0_158] : memref<2x1x64xf32, #tpu.memory_space<vmem>>, vector<1x1x64xf32>
    %350 = vector.shape_cast %349 : vector<1x1x64xf32> to vector<1x64xf32>
    %351 = vector.broadcast %350 : vector<1x64xf32> to vector<16x64xf32>
    %352 = arith.addf %348, %351 : vector<16x64xf32>
    %353 = arith.mulf %352, %352 : vector<16x64xf32>
    %354 = arith.mulf %352, %353 : vector<16x64xf32>
    %cst_159 = arith.constant 4.471500e-02 : f32
    %355 = vector.broadcast %cst_159 : f32 to vector<16x64xf32>
    %356 = arith.mulf %355, %354 : vector<16x64xf32>
    %357 = arith.addf %352, %356 : vector<16x64xf32>
    %cst_160 = arith.constant 0.797884583 : f32
    %358 = vector.broadcast %cst_160 : f32 to vector<16x64xf32>
    %359 = arith.mulf %358, %357 : vector<16x64xf32>
    %360 = math.tanh %359 : vector<16x64xf32>
    %cst_161 = arith.constant 1.000000e+00 : f32
    %361 = vector.broadcast %cst_161 : f32 to vector<16x64xf32>
    %362 = arith.addf %361, %360 : vector<16x64xf32>
    %cst_162 = arith.constant 5.000000e-01 : f32
    %363 = vector.broadcast %cst_162 : f32 to vector<16x64xf32>
    %364 = arith.mulf %363, %362 : vector<16x64xf32>
    %365 = arith.mulf %352, %364 : vector<16x64xf32>
    %c1_163 = arith.constant 1 : index
    %c0_164 = arith.constant 0 : index
    %c0_165 = arith.constant 0 : index
    %366 = vector.load %arg12[%c1_163, %c0_164, %c0_165] : memref<2x64x32xf32, #tpu.memory_space<vmem>>, vector<1x64x32xf32>
    %367 = vector.shape_cast %366 : vector<1x64x32xf32> to vector<64x32xf32>
    %cst_166 = arith.constant dense<0.000000e+00> : vector<16x32xf32>
    %368 = tpu.matmul %365, %367, %cst_166 {dimension_numbers = #tpu.dot_dimension_numbers<[1], [0], [0], [1], [0, 0, 1, 1], [], []>} : vector<16x64xf32>, vector<64x32xf32>, vector<16x32xf32> -> vector<16x32xf32>
    %c1_167 = arith.constant 1 : index
    %c0_168 = arith.constant 0 : index
    %c0_169 = arith.constant 0 : index
    %369 = vector.load %arg13[%c1_167, %c0_168, %c0_169] : memref<2x1x32xf32, #tpu.memory_space<vmem>>, vector<1x1x32xf32>
    %370 = vector.shape_cast %369 : vector<1x1x32xf32> to vector<1x32xf32>
    %371 = vector.broadcast %370 : vector<1x32xf32> to vector<16x32xf32>
    %372 = arith.addf %368, %371 : vector<16x32xf32>
    %373 = arith.addf %372, %345 : vector<16x32xf32>
    %c1_170 = arith.constant 1 : index
    %c0_171 = arith.constant 0 : index
    %c0_172 = arith.constant 0 : index
    %374 = vector.load %arg14[%c1_170, %c0_171, %c0_172] : memref<2x1x32xf32, #tpu.memory_space<vmem>>, vector<1x1x32xf32>
    %375 = vector.shape_cast %374 : vector<1x1x32xf32> to vector<1x32xf32>
    %c1_173 = arith.constant 1 : index
    %c0_174 = arith.constant 0 : index
    %c0_175 = arith.constant 0 : index
    %376 = vector.load %arg15[%c1_173, %c0_174, %c0_175] : memref<2x1x32xf32, #tpu.memory_space<vmem>>, vector<1x1x32xf32>
    %377 = vector.shape_cast %376 : vector<1x1x32xf32> to vector<1x32xf32>
    %cst_176 = arith.constant dense<0.000000e+00> : vector<16xf32>
    %378 = vector.multi_reduction <add>, %373, %cst_176 [1] : vector<16x32xf32> to vector<16xf32>
    %379 = vector.shape_cast %378 : vector<16xf32> to vector<16x1xf32>
    %cst_177 = arith.constant 3.200000e+01 : f32
    %380 = vector.broadcast %cst_177 : f32 to vector<16x1xf32>
    %381 = arith.divf %379, %380 : vector<16x1xf32>
    %382 = vector.broadcast %381 : vector<16x1xf32> to vector<16x32xf32>
    %383 = arith.subf %373, %382 : vector<16x32xf32>
    %384 = arith.mulf %383, %383 : vector<16x32xf32>
    %cst_178 = arith.constant dense<0.000000e+00> : vector<16xf32>
    %385 = vector.multi_reduction <add>, %384, %cst_178 [1] : vector<16x32xf32> to vector<16xf32>
    %386 = vector.shape_cast %385 : vector<16xf32> to vector<16x1xf32>
    %cst_179 = arith.constant 3.200000e+01 : f32
    %387 = vector.broadcast %cst_179 : f32 to vector<16x1xf32>
    %388 = arith.divf %386, %387 : vector<16x1xf32>
    %cst_180 = arith.constant 9.99999996E-13 : f32
    %389 = vector.broadcast %cst_180 : f32 to vector<16x1xf32>
    %390 = arith.addf %388, %389 : vector<16x1xf32>
    %391 = math.rsqrt %390 : vector<16x1xf32>
    %392 = vector.broadcast %391 : vector<16x1xf32> to vector<16x32xf32>
    %393 = arith.mulf %383, %392 : vector<16x32xf32>
    %394 = vector.broadcast %375 : vector<1x32xf32> to vector<16x32xf32>
    %395 = arith.mulf %393, %394 : vector<16x32xf32>
    %396 = vector.broadcast %377 : vector<1x32xf32> to vector<16x32xf32>
    %397 = arith.addf %395, %396 : vector<16x32xf32>
    %cst_181 = arith.constant dense<0.000000e+00> : vector<2xf32>
    %398 = vector.multi_reduction <add>, %23, %cst_181 [1] : vector<2x8xf32> to vector<2xf32>
    %399 = vector.shape_cast %398 : vector<2xf32> to vector<2x1xf32>
    %cst_182 = arith.constant 1.000000e+00 : f32
    %400 = vector.broadcast %cst_182 : f32 to vector<2x1xf32>
    %401 = arith.divf %400, %399 : vector<2x1xf32>
    %402 = vector.extract_strided_slice %23 {offsets = [0, 0], sizes = [1, 8], strides = [1, 1]} : vector<2x8xf32> to vector<1x8xf32>
    %403 = vector.extract_strided_slice %397 {offsets = [0, 0], sizes = [8, 32], strides = [1, 1]} : vector<16x32xf32> to vector<8x32xf32>
    %cst_183 = arith.constant dense<0.000000e+00> : vector<1x32xf32>
    %404 = tpu.matmul %402, %403, %cst_183 {dimension_numbers = #tpu.dot_dimension_numbers<[1], [0], [0], [1], [0, 0, 1, 1], [], []>} : vector<1x8xf32>, vector<8x32xf32>, vector<1x32xf32> -> vector<1x32xf32>
    %405 = vector.extract_strided_slice %401 {offsets = [0, 0], sizes = [1, 1], strides = [1, 1]} : vector<2x1xf32> to vector<1x1xf32>
    %406 = vector.broadcast %405 : vector<1x1xf32> to vector<1x32xf32>
    %407 = arith.mulf %404, %406 : vector<1x32xf32>
    %c0_184 = arith.constant 0 : index
    %c0_185 = arith.constant 0 : index
    %408 = vector.load %arg16[%c0_184, %c0_185] : memref<32x3xf32, #tpu.memory_space<vmem>>, vector<32x3xf32>
    %cst_186 = arith.constant dense<0.000000e+00> : vector<1x3xf32>
    %409 = tpu.matmul %407, %408, %cst_186 {dimension_numbers = #tpu.dot_dimension_numbers<[1], [0], [0], [1], [0, 0, 1, 1], [], []>} : vector<1x32xf32>, vector<32x3xf32>, vector<1x3xf32> -> vector<1x3xf32>
    %c0_187 = arith.constant 0 : index
    %c0_188 = arith.constant 0 : index
    %410 = vector.load %arg17[%c0_187, %c0_188] : memref<1x3xf32, #tpu.memory_space<vmem>>, vector<1x3xf32>
    %411 = arith.addf %409, %410 : vector<1x3xf32>
    %c0_189 = arith.constant 0 : index
    %c0_190 = arith.constant 0 : index
    %412 = vector.load %arg19[%c0_189, %c0_190] : memref<2x3xf32, #tpu.memory_space<vmem>>, vector<1x3xf32>
    tpu.vector_store %arg19[%c0_189, %c0_190], %411 {strides = array<i32>} : memref<2x3xf32, #tpu.memory_space<vmem>>, vector<1x3xf32>,
    %413 = vector.extract_strided_slice %23 {offsets = [1, 0], sizes = [1, 8], strides = [1, 1]} : vector<2x8xf32> to vector<1x8xf32>
    %414 = vector.extract_strided_slice %397 {offsets = [8, 0], sizes = [8, 32], strides = [1, 1]} : vector<16x32xf32> to vector<8x32xf32>
    %cst_191 = arith.constant dense<0.000000e+00> : vector<1x32xf32>
    %415 = tpu.matmul %413, %414, %cst_191 {dimension_numbers = #tpu.dot_dimension_numbers<[1], [0], [0], [1], [0, 0, 1, 1], [], []>} : vector<1x8xf32>, vector<8x32xf32>, vector<1x32xf32> -> vector<1x32xf32>
    %416 = vector.extract_strided_slice %401 {offsets = [1, 0], sizes = [1, 1], strides = [1, 1]} : vector<2x1xf32> to vector<1x1xf32>
    %417 = vector.broadcast %416 : vector<1x1xf32> to vector<1x32xf32>
    %418 = arith.mulf %415, %417 : vector<1x32xf32>
    %c0_192 = arith.constant 0 : index
    %c0_193 = arith.constant 0 : index
    %419 = vector.load %arg16[%c0_192, %c0_193] : memref<32x3xf32, #tpu.memory_space<vmem>>, vector<32x3xf32>
    %cst_194 = arith.constant dense<0.000000e+00> : vector<1x3xf32>
    %420 = tpu.matmul %418, %419, %cst_194 {dimension_numbers = #tpu.dot_dimension_numbers<[1], [0], [0], [1], [0, 0, 1, 1], [], []>} : vector<1x32xf32>, vector<32x3xf32>, vector<1x3xf32> -> vector<1x3xf32>
    %c0_195 = arith.constant 0 : index
    %c0_196 = arith.constant 0 : index
    %421 = vector.load %arg17[%c0_195, %c0_196] : memref<1x3xf32, #tpu.memory_space<vmem>>, vector<1x3xf32>
    %422 = arith.addf %420, %421 : vector<1x3xf32>
    %c1_197 = arith.constant 1 : index
    %c0_198 = arith.constant 0 : index
    %423 = vector.load %arg19[%c1_197, %c0_198] : memref<2x3xf32, #tpu.memory_space<vmem>>, vector<1x3xf32>
    tpu.vector_store %arg19[%c1_197, %c0_198], %422 {strides = array<i32>} : memref<2x3xf32, #tpu.memory_space<vmem>>, vector<1x3xf32>,
    %c0_199 = arith.constant 0 : index
    %c0_200 = arith.constant 0 : index
    %424 = vector.load %arg19[%c0_199, %c0_200] : memref<2x3xf32, #tpu.memory_space<vmem>>, vector<2x3xf32>
    %c0_201 = arith.constant 0 : index
    %c0_202 = arith.constant 0 : index
    %425 = vector.load %arg18[%c0_201, %c0_202] : memref<2x3xf32, #tpu.memory_space<vmem>>, vector<2x3xf32>
    %cst_203 = arith.constant 0.000000e+00 : f32
    %426 = vector.broadcast %cst_203 : f32 to vector<2x3xf32>
    %427 = arith.maximumf %424, %426 : vector<2x3xf32>
    %428 = arith.mulf %424, %425 : vector<2x3xf32>
    %429 = arith.subf %427, %428 : vector<2x3xf32>
    %430 = math.absf %424 : vector<2x3xf32>
    %cst_204 = arith.constant 0.000000e+00 : f32
    %431 = vector.broadcast %cst_204 : f32 to vector<2x3xf32>
    %432 = arith.subf %431, %430 : vector<2x3xf32>
    %433 = math.exp %432 : vector<2x3xf32>
    %434 = math.log1p %433 : vector<2x3xf32>
    %435 = arith.addf %429, %434 : vector<2x3xf32>
    %cst_205 = arith.constant dense<0.000000e+00> : vector<2xf32>
    %436 = vector.multi_reduction <add>, %435, %cst_205 [1] : vector<2x3xf32> to vector<2xf32>
    %437 = vector.shape_cast %436 : vector<2xf32> to vector<2x1xf32>
    %cst_206 = arith.constant 3.000000e+00 : f32
    %438 = vector.broadcast %cst_206 : f32 to vector<2x1xf32>
    %439 = arith.divf %437, %438 : vector<2x1xf32>
    %cst_207 = arith.constant dense<0.000000e+00> : vector<1xf32>
    %440 = vector.multi_reduction <add>, %439, %cst_207 [0] : vector<2x1xf32> to vector<1xf32>
    %441 = vector.shape_cast %440 : vector<1xf32> to vector<1x1xf32>
    %cst_208 = arith.constant 2.000000e+00 : f32
    %442 = vector.broadcast %cst_208 : f32 to vector<1x1xf32>
    %443 = arith.divf %441, %442 : vector<1x1xf32>
    %c0_209 = arith.constant 0 : index
    %c0_210 = arith.constant 0 : index
    %444 = vector.load %arg20[%c0_209, %c0_210] : memref<1x1xf32, #tpu.memory_space<vmem>>, vector<1x1xf32>
    tpu.vector_store %arg20[%c0_209, %c0_210], %443 {strides = array<i32>} : memref<1x1xf32, #tpu.memory_space<vmem>>, vector<1x1xf32>,
    return
  }
}

</mosaic_0001>

<bundles_post_ra>
// kernel: tpu_custom_call.1
= control target key start
LH: loop header
LB: loop body
LE: loop exit
PB: predicated region body
PF: predicated region fallthrough
CT: control target
= control target key end

     0   :  { %s4438_s0 = inlined_call_operand.vmem [shape: f32[16,32], index: 0, kind: input, shape index: {}]   ;;  %s4439_s1 = inlined_call_operand.vmem [shape: f32[2,8], index: 1, kind: input, shape index: {}]   ;;  %s4440_s2 = inlined_call_operand.vmem [shape: f32[1,32], index: 2, kind: input, shape index: {}]   ;;  %s4441_s3 = inlined_call_operand.vmem [shape: f32[1,32], index: 3, kind: input, shape index: {}]   ;;  %s4442_s4 = inlined_call_operand.vmem [shape: f32[2,32,96], index: 4, kind: input, shape index: {}]   ;;  %s4443_s5 = inlined_call_operand.vmem [shape: f32[2,1,96], index: 5, kind: input, shape index: {}]   ;;  %s4444_s6 = inlined_call_operand.vmem [shape: f32[2,32,32], index: 6, kind: input, shape index: {}]   ;;  %s4445_s7 = inlined_call_operand.vmem [shape: f32[2,1,32], index: 7, kind: input, shape index: {}]   ;;  %s4446_s8 = inlined_call_operand.vmem [shape: f32[2,1,32], index: 8, kind: input, shape index: {}]   ;;  %s4447_s9 = inlined_call_operand.vmem [shape: f32[2,1,32], index: 9, kind: input, shape index: {}]   ;;  %s4448_s10 = inlined_call_operand.vmem [shape: f32[2,32,64], index: 10, kind: input, shape index: {}]   ;;  %s4449_s11 = inlined_call_operand.vmem [shape: f32[2,1,64], index: 11, kind: input, shape index: {}]   ;;  %s4450_s12 = inlined_call_operand.vmem [shape: f32[2,64,32], index: 12, kind: input, shape index: {}]   ;;  %s4451_s13 = inlined_call_operand.vmem [shape: f32[2,1,32], index: 13, kind: input, shape index: {}]   ;;  %s4452_s14 = inlined_call_operand.vmem [shape: f32[2,1,32], index: 14, kind: input, shape index: {}]   ;;  %s4453_s15 = inlined_call_operand.vmem [shape: f32[2,1,32], index: 15, kind: input, shape index: {}]   ;;  %s4454_s16 = inlined_call_operand.vmem [shape: f32[32,3], index: 16, kind: input, shape index: {}]   ;;  %s4455_s17 = inlined_call_operand.vmem [shape: f32[1,3], index: 17, kind: input, shape index: {}]   ;;  %s4456_s18 = inlined_call_operand.vmem [shape: f32[2,3], index: 18, kind: input, shape index: {}]   ;;  %s4457_s19 = inlined_call_operand.hbm [shape: f32[2,3], index: 19, kind: output, shape index: {0}]   ;;  %s4458_s20 = inlined_call_operand.hbm [shape: f32[1,1], index: 20, kind: output, shape index: {1}]  }
   0x1   :  { %4462 = sst [smem:[#allocation9_spill]] %s4438_s0 }
   0x2   :  { %4463 = sst [smem:[#allocation10_spill]] %s4439_s1 }
   0x3   :  { %4464 = sst [smem:[#allocation11_spill]] %s4440_s2 }
   0x4   :  { %4465 = sst [smem:[#allocation12_spill]] %s4441_s3 }
   0x5   :  { %4466 = sst [smem:[#allocation13_spill]] %s4442_s4 }
   0x6   :  { %26 = vsyncpa [#allocation4], 0  ;;  %s4467_s23 = sld [smem:[#allocation9_spill]]  ;;  %vm70_vm0 = vcmask 261120  }
   0xc   :  { %v66_v0 = vld [vmem:[%s4467_s23] sm:$0xff]  ;;  %v67_v1 = vld [vmem:[%s4467_s23 + $0x8] sm:$0xff] }
   0xd   :  { %27 = vsyncpa [#allocation6], 0  ;;  %v71_v2 = vsel %vm70_vm0, %v66_v0, 0.0  ;;  %v74_v3 = vsel %vm70_vm0, %v67_v1, 0.0  ;;  %s4468_s26 = sld [smem:[#allocation13_spill]]  ;;  %v3829_v34 = vmov 0.0   ;;  %v292_v41 = vlaneseq }
   0xe   :  { %72 = vadd.xlane.f32.xlu0 %v71_v2  ;;  %s4469_s22 = sld [smem:[#allocation11_spill]]  ;;  %3470 = vmatprep.subr.mxu1 %v3829_v34  ;;  %vm3830_vm1 = vmmov 0   ;;  %v3253_v35 = vld [vmem:[%s4443_s5] ss:$0 sm:$0xff]  ;;  %s3831_s27 = smov 96   ;;  %vm216_vm2 = vcmask 130048  }
   0xf   :  { %s4470_s2 = sld [smem:[#allocation12_spill]]  ;;  %3472 = vmatprep.mubr.msk.f32.mxu1 %vm3830_vm1, %v3829_v34  ;;  %s3832_s28 = smov 80   ;;  %v4000_v44 = vshrl.u32 %v292_v41, 7  ;;  %vm297_vm3 = vcmask 64512   ;;  %vm1365_vm4 = vcmask 523264   ;;  %vm2870_vm5 = vcmask 58368  }
  0x10   :  { %s4471_s30 = sld [smem:[#allocation10_spill]]  ;;  %s3833_s0 = smov 64   ;;  %vm3028_vm6 = vcmask 16384   ;;  %vm3205_vm8 = vcmask 17408  }
  0x11   :  { %v294_v46 = vsub.s32 0, %v4000_v44  ;;  %s3834_s21 = smov 112   ;;  %s3835_s1 = smov 48  }
  0x12   :  { %75 = vadd.xlane.f32.xlu0 %v74_v3 }
  0x13   :  { %v120_v14 = vld [vmem:[%s4468_s26 + $0x18] sm:$0xff]  ;;  %v119_v15 = vld [vmem:[%s4468_s26 + $0x10] sm:$0xff]  ;;  %v118_v16 = vld [vmem:[%s4468_s26 + $0x8] sm:$0xff] }
  0x14   :  { %3459 = vmatprep.subr.mxu0 %v120_v14  ;;  %v117_v17 = vld [vmem:[%s4468_s26] sm:$0xff] }
  0x15   :  { %3460 = vmatpush3.msra.mxu0 %v120_v14  ;;  %v3251_v25 = vld [vmem:[%s4469_s22] ss:$0 sm:$0xff]  ;;  %v211_v14 = vld [vmem:[%s4444_s6 + $0x10] sm:$0xff] }
  0x16   :  { %3461 = vmatprep.subr.mxu0 %v119_v15  ;;  %v3252_v27 = vld [vmem:[%s4470_s2] ss:$0 sm:$0xff] }
  0x17   :  { %3462 = vmatpush3.msra.mxu0 %v119_v15  ;;  %v114_v42 = vld [vmem:[%s4471_s30] sm:$0x3] }
  0x18   :  { %3463 = vmatprep.subr.mxu0 %v118_v16  ;;  %v115_v43 = vsub.f32 1.0, %v114_v42 }
  0x19   :  { %3464 = vmatpush3.msra.mxu0 %v118_v16 }
  0x1a   :  { %3465 = vmatprep.subr.mxu0 %v117_v17  ;;  %v4002_v45 = vmul.f32 -1e+09, %v115_v43 }
  0x1b   :  { %3466 = vmatpush3.msra.mxu0 %v117_v17 }
  0x1c   :  { %3490 = vmatprep.subr.mxu0 %v3829_v34  ;;  %v4006_v47 = vrot.slane %v4002_v45, %v294_v46 }
  0x97   :  { %v73_v4 = vpop.xlane.xlu0 %72 }
  0x98   :  { %v78_v5 = vmul.f32 0.03125, %v73_v4 }
  0x9a   :  { %v80_v6 = vsub.f32 %v66_v0, %v78_v5 }
  0x9b   :  { %v76_v7 = vpop.xlane.xlu0 %75 }
  0x9c   :  { %v79_v8 = vmul.f32 0.03125, %v76_v7  ;;  %v82_v9 = vmul.f32 %v80_v6, %v80_v6 }
  0x9e   :  { %v81_v10 = vsub.f32 %v67_v1, %v79_v8  ;;  %v84_v11 = vsel %vm70_vm0, %v82_v9, 0.0 }
  0x9f   :  { %85 = vadd.xlane.f32.xlu1 %v84_v11 }
  0xa0   :  { %v83_v12 = vmul.f32 %v81_v10, %v81_v10 }
  0xa2   :  { %v87_v13 = vsel %vm70_vm0, %v83_v12, 0.0 }
  0xa3   :  { %88 = vadd.xlane.f32.xlu1 %v87_v13  ;;  %v212_v13 = vld [vmem:[%s4444_s6 + $0x18] sm:$0xff] }
 0x128   :  { %v86_v18 = vpop.xlane.xlu1 %85 }
 0x129   :  { %v90_v19 = vmul.f32 0.03125, %v86_v18  ;;  %v4044_v18 = vld [vmem:[%s4444_s6 + $0x8] sm:$0xff] }
 0x12b   :  { %v92_v20 = vadd.f32 1e-12, %v90_v19  ;;  %v4050_v19 = vld [vmem:[%s4444_s6] sm:$0xff] }
 0x12c   :  { %v89_v21 = vpop.xlane.xlu1 %88 }
 0x12d   :  { %3718 = vrsqrt.f32 %v92_v20  ;;  %v91_v22 = vmul.f32 0.03125, %v89_v21 }
 0x12f   :  { %v93_v23 = vadd.f32 1e-12, %v91_v22 }
 0x131   :  { %3720 = vrsqrt.f32 %v93_v23 }
 0x13a   :  { %v3719_v24 = vpop.eup %3718 }
 0x13b   :  { %v96_v26 = vmul.f32 %v3719_v24, %v80_v6 }
 0x13d   :  { %v104_v28 = vmul.f32 %v3251_v25, %v96_v26 }
 0x13e   :  { %v3721_v29 = vpop.eup %3720 }
 0x13f   :  { %v97_v30 = vmul.f32 %v3721_v29, %v81_v10  ;;  %v3971_v31 = vadd.f32 %v3252_v27, %v104_v28 }
 0x141   :  { %v105_v32 = vmul.f32 %v3251_v25, %v97_v30  ;;  %3467 = vmatprep.mubr.msk.f32.mxu0 %vm70_vm0, %v3971_v31 }
 0x143   :  { %v3975_v33 = vadd.f32 %v3252_v27, %v105_v32  ;;  %v779_v27 = vsub.s32 1, %v4000_v44 }
 0x145   :  { %3468 = vmatmul.mubr.msk.f32.vlgmr.msra.gmra.mxu0 %vm70_vm0, %v3975_v33  ;;  %v4079_v32 = vrot.slane %v4002_v45, %v779_v27 }
 0x146   :  { %3494 = vmatprep.mubr.msk.f32.mxu0 %vm3830_vm1, %v3829_v34  ;;  %3491 = vmatpush3.msra.mxu0 %v212_v13 }
 0x147   :  { %3492 = vmatprep.subr.mxu0 %v3829_v34 }
 0x148   :  { %3493 = vmatpush3.msra.mxu0 %v211_v14 }
 0x149   :  { %3504 = vmatprep.subr.mxu0 %v3829_v34 }
 0x205   :  { %v3469_v36 = vpop.f32.mrf.mxu0 }
 0x206   :  { %v3988_v37 = vadd.f32 %v3469_v36, %v3253_v35 }
 0x207   :  { %v200_v38 = vpop.f32.mrf.mxu0 }
 0x208   :  { %v201_v39 = vadd.f32 %v3253_v35, %v200_v38 }
 0x20a   :  { %214 = vrot.lane.b32.xlu0 %v201_v39, %s3831_s27 }
 0x20e   :  { %387 = vrot.lane.b32.xlu0 %v201_v39, %s3832_s28 }
 0x27c   :  { %v215_v40 = vpop.permute.xlu0 %214 }
 0x27d   :  { %3471 = vmatpush3.xpose.msk.msra.mxu1 %vm216_vm2, %v215_v40 }
 0x27e   :  { %3475 = vmatprep.subr.mxu1 %v3829_v34 }
 0x280   :  { %3473 = vmatmul.mubr.msk.f32.vlgmr.msra.gmra.mxu1 %vm216_vm2, %v201_v39  ;;  %v388_v62 = vpop.permute.xlu0 %387 }
 0x281   :  { %3477 = vmatprep.mubr.msk.f32.mxu1 %vm3830_vm1, %v3829_v34 }
 0x340   :  { %v287_v48 = vpop.f32.mrf.mxu1 }
 0x341   :  { %v291_v49 = vmul.f32 0.25, %v287_v48  ;;  %v3272_v48 = vld [vmem:[%s4445_s7] ss:$0 sm:$0xff] }
 0x342   :  { %v3474_v50 = vpop.f32.mrf.mxu1 }
 0x343   :  { %v296_v51 = vadd.f32 %v4006_v47, %v291_v49 }
 0x345   :  { %v298_v52 = vsel %vm297_vm3, %v296_v51, -inf }
 0x346   :  { %299 = vmax.xlane.f32.xlu1 %v298_v52 }
 0x357   :  { %309 = vrot.lane.b32.xlu1 %v201_v39, %s3833_s0 }
 0x3cf   :  { %v300_v53 = vpop.xlane.xlu1 %299 }
 0x3d0   :  { %v301_v54 = vsub.f32 %v296_v51, %v300_v53 }
 0x3d2   :  { %v302_v55 = vmul.f32 1.442695, %v301_v54 }
 0x3d3   :  { %v310_v56 = vpop.permute.xlu1 %309 }
 0x3d4   :  { %3722 = vpow2.f32 %v302_v55  ;;  %3476 = vmatpush3.msra.mxu1 %v310_v56 }
 0x3d5   :  { %3480 = vmatprep.subr.mxu1 %v3829_v34 }
 0x3e1   :  { %v3723_v57 = vpop.eup %3722 }
 0x3e2   :  { %v304_v58 = vsel %vm297_vm3, %v3723_v57, 0.0 }
 0x3e3   :  { %305 = vadd.xlane.f32.xlu1 %v304_v58 }
 0x3f4   :  { %385 = vrot.lane.b32.xlu1 %v201_v39, %s3834_s21 }
 0x46c   :  { %v306_v59 = vpop.xlane.xlu1 %305 }
 0x46d   :  { %3724 = vrcp.f32 %v306_v59 }
 0x470   :  { %v386_v63 = vpop.permute.xlu1 %385 }
 0x47a   :  { %v3725_v60 = vpop.eup %3724 }
 0x47b   :  { %v308_v61 = vmul.f32 %v3725_v60, %v3723_v57 }
 0x47d   :  { %3478 = vmatmul.mubr.msk.f32.vlgmr.msra.gmra.mxu1 %vm297_vm3, %v308_v61 }
 0x47e   :  { %3481 = vmatpush3.xpose.msk.msra.mxu1 %vm216_vm2, %v388_v62  ;;  %3482 = vmatprep.mubr.msk.f32.mxu1 %vm3830_vm1, %v3829_v34 }
 0x47f   :  { %3485 = vmatprep.subr.mxu1 %v3829_v34 }
 0x481   :  { %3483 = vmatmul.mubr.msk.f32.vlgmr.msra.gmra.mxu1 %vm216_vm2, %v386_v63 }
 0x482   :  { %3487 = vmatprep.mubr.msk.f32.mxu1 %vm3830_vm1, %v3829_v34 }
 0x53d   :  { %v381_v0 = vpop.f32.mrf.mxu1 }
 0x53f   :  { %v3479_v1 = vpop.f32.mrf.mxu1 }
 0x541   :  { %v459_v2 = vpop.f32.mrf.mxu1 }
 0x542   :  { %v463_v3 = vmul.f32 0.25, %v459_v2 }
 0x543   :  { %v3484_v4 = vpop.f32.mrf.mxu1 }
 0x544   :  { %v464_v5 = vadd.f32 %v463_v3, %v4006_v47 }
 0x546   :  { %v465_v6 = vsel %vm297_vm3, %v464_v5, -inf }
 0x547   :  { %466 = vmax.xlane.f32.xlu0 %v465_v6 }
 0x55d   :  { %476 = vrot.lane.b32.xlu0 %v201_v39, %s3835_s1 }
 0x561   :  { %871 = vrot.lane.b32.xlu0 %v3988_v37, %s3832_s28 }
 0x5d0   :  { %v467_v7 = vpop.xlane.xlu0 %466 }
 0x5d1   :  { %v468_v8 = vsub.f32 %v464_v5, %v467_v7 }
 0x5d3   :  { %v469_v9 = vmul.f32 1.442695, %v468_v8 }
 0x5d4   :  { %v477_v10 = vpop.permute.xlu0 %476 }
 0x5d5   :  { %3726 = vpow2.f32 %v469_v9  ;;  %3486 = vmatpush3.msra.mxu1 %v477_v10 }
 0x5d6   :  { %3497 = vmatprep.subr.mxu1 %v3829_v34 }
 0x5d8   :  { %v872_v24 = vpop.permute.xlu0 %871 }
 0x5e2   :  { %v3727_v11 = vpop.eup %3726 }
 0x5e3   :  { %v471_v12 = vsel %vm297_vm3, %v3727_v11, 0.0 }
 0x5e4   :  { %472 = vadd.xlane.f32.xlu1 %v471_v12 }
 0x5f5   :  { %700 = vrot.lane.b32.xlu1 %v3988_v37, %s3831_s27 }
 0x5f9   :  { %869 = vrot.lane.b32.xlu1 %v3988_v37, %s3834_s21 }
 0x66d   :  { %v473_v15 = vpop.xlane.xlu1 %472 }
 0x66e   :  { %3728 = vrcp.f32 %v473_v15 }
 0x671   :  { %v701_v21 = vpop.permute.xlu1 %700 }
 0x675   :  { %v870_v26 = vpop.permute.xlu1 %869 }
 0x67b   :  { %v3729_v16 = vpop.eup %3728 }
 0x67c   :  { %v475_v17 = vmul.f32 %v3729_v16, %v3727_v11 }
 0x67e   :  { %3488 = vmatmul.mubr.msk.f32.vlgmr.msra.gmra.mxu1 %vm297_vm3, %v475_v17 }
 0x67f   :  { %3498 = vmatpush3.msra.mxu1 %v4044_v18  ;;  %3501 = vmatprep.mubr.msk.f32.mxu1 %vm3830_vm1, %v3829_v34 }
 0x680   :  { %3499 = vmatprep.subr.mxu1 %v3829_v34 }
 0x681   :  { %3500 = vmatpush3.msra.mxu1 %v4050_v19 }
 0x682   :  { %3502 = vmatmul.mubr.msk.f32.vlgmr.msra.gmra.mxu1 %vm216_vm2, %v381_v0  ;;  %3509 = vmatprep.subr.mxu1 %v3829_v34 }
 0x683   :  { %3511 = vmatprep.mubr.msk.f32.mxu1 %vm3830_vm1, %v3829_v34 }
 0x73e   :  { %v548_v20 = vpop.f32.mrf.mxu1 }
 0x73f   :  { %3495 = vmatmul.mubr.msk.f32.vlgmr.msra.gmra.mxu0 %vm216_vm2, %v548_v20 }
 0x740   :  { %3505 = vmatpush3.xpose.msk.msra.mxu0 %vm216_vm2, %v701_v21  ;;  %v3489_v22 = vpop.f32.mrf.mxu1  ;;  %3506 = vmatprep.mubr.msk.f32.mxu0 %vm3830_vm1, %v3829_v34 }
 0x741   :  { %3514 = vmatprep.subr.mxu0 %v3829_v34 }
 0x742   :  { %v694_v23 = vpop.f32.mrf.mxu1 }
 0x743   :  { %3507 = vmatmul.mubr.msk.f32.vlgmr.msra.gmra.mxu0 %vm216_vm2, %v3988_v37 }
 0x744   :  { %3515 = vmatpush3.xpose.msk.msra.mxu0 %vm216_vm2, %v872_v24  ;;  %v3503_v25 = vpop.f32.mrf.mxu1  ;;  %3516 = vmatprep.mubr.msk.f32.mxu0 %vm3830_vm1, %v3829_v34 }
 0x745   :  { %3524 = vmatprep.subr.mxu0 %v3829_v34 }
 0x747   :  { %3517 = vmatmul.mubr.msk.f32.vlgmr.msra.gmra.mxu0 %vm216_vm2, %v870_v26 }
 0x748   :  { %3525 = vmatpush3.msra.mxu0 %v212_v13  ;;  %3528 = vmatprep.mubr.msk.f32.mxu0 %vm3830_vm1, %v3829_v34 }
 0x749   :  { %3526 = vmatprep.subr.mxu0 %v3829_v34 }
 0x74a   :  { %3527 = vmatpush3.msra.mxu0 %v211_v14 }
 0x7ff   :  { %v621_v28 = vpop.f32.mrf.mxu0 }
 0x800   :  { %v695_v29 = vadd.f32 %v694_v23, %v621_v28 }
 0x801   :  { %v3496_v30 = vpop.f32.mrf.mxu0 }
 0x802   :  { %698 = vst.msk [vmem:[#allocation2] sm:$0xff] %vm70_vm0, %v695_v29 }
 0x803   :  { %v772_v35 = vpop.f32.mrf.mxu0 }
 0x804   :  { %v776_v36 = vmul.f32 0.25, %v772_v35 }
 0x805   :  { %v3508_v38 = vpop.f32.mrf.mxu0 }
 0x806   :  { %v781_v39 = vadd.f32 %v4079_v32, %v776_v36  ;;  %v3274_v36 = vld [vmem:[%s4447_s9] ss:$0 sm:$0xff] }
 0x807   :  { %v943_v40 = vpop.f32.mrf.mxu0 }
 0x808   :  { %v947_v41 = vmul.f32 0.25, %v943_v40  ;;  %v782_v42 = vsel %vm297_vm3, %v781_v39, -inf  ;;  %v1243_v40 = vld [vmem:[%s4448_s10 + $0x18] sm:$0xff] }
 0x809   :  { %783 = vmax.xlane.f32.xlu0 %v782_v42  ;;  %v3518_v43 = vpop.f32.mrf.mxu0  ;;  %v1183_v45 = vld [vmem:[#allocation2] sm:$0xff]  ;;  %3538 = vmatprep.subr.mxu0 %v1243_v40  ;;  %v1241_v42 = vld [vmem:[%s4448_s10 + $0x8] sm:$0xff] }
 0x80a   :  { %v948_v44 = vadd.f32 %v947_v41, %v4079_v32  ;;  %v1192_v49 = vadd.f32 %v3272_v48, %v1183_v45  ;;  %v1242_v41 = vld [vmem:[%s4448_s10 + $0x10] sm:$0xff]  ;;  %v1240_v43 = vld [vmem:[%s4448_s10] sm:$0xff] }
 0x80c   :  { %v949_v46 = vsel %vm297_vm3, %v948_v44, -inf  ;;  %v1194_v50 = vadd.f32 %v1192_v49, %v3971_v31 }
 0x80d   :  { %950 = vmax.xlane.f32.xlu1 %v949_v46 }
 0x80e   :  { %v1198_v51 = vsel %vm70_vm0, %v1194_v50, 0.0 }
 0x81e   :  { %960 = vrot.lane.b32.xlu1 %v3988_v37, %s3835_s1 }
 0x842   :  { %1199 = vadd.xlane.f32.xlu1 %v1198_v51 }
 0x892   :  { %v784_v52 = vpop.xlane.xlu0 %783 }
 0x893   :  { %v785_v53 = vsub.f32 %v781_v39, %v784_v52  ;;  %v1357_v52 = vld [vmem:[%s4450_s12 + $0x38] sm:$0xff] }
 0x895   :  { %v786_v54 = vmul.f32 1.442695, %v785_v53  ;;  %v1356_v53 = vld [vmem:[%s4450_s12 + $0x30] sm:$0xff] }
 0x896   :  { %v951_v55 = vpop.xlane.xlu1 %950 }
 0x897   :  { %3730 = vpow2.f32 %v786_v54  ;;  %v952_v56 = vsub.f32 %v948_v44, %v951_v55  ;;  %v1355_v54 = vld [vmem:[%s4450_s12 + $0x28] sm:$0xff]  ;;  %v1354_v55 = vld [vmem:[%s4450_s12 + $0x20] sm:$0xff] }
 0x899   :  { %v953_v57 = vmul.f32 1.442695, %v952_v56  ;;  %v1353_v56 = vld [vmem:[%s4450_s12 + $0x18] sm:$0xff] }
 0x89a   :  { %v961_v2 = vpop.permute.xlu1 %960 }
 0x89b   :  { %3732 = vpow2.f32 %v953_v57  ;;  %v1352_v57 = vld [vmem:[%s4450_s12 + $0x10] sm:$0xff] }
 0x8a4   :  { %v3731_v58 = vpop.eup %3730 }
 0x8a5   :  { %v788_v59 = vsel %vm297_vm3, %v3731_v58, 0.0 }
 0x8a6   :  { %789 = vadd.xlane.f32.xlu0 %v788_v59  ;;  %v1350_v59 = vld [vmem:[%s4450_s12] sm:$0xff] }
 0x8a8   :  { %v3733_v60 = vpop.eup %3732 }
 0x8a9   :  { %v955_v61 = vsel %vm297_vm3, %v3733_v60, 0.0 }
 0x8aa   :  { %956 = vadd.xlane.f32.xlu0 %v955_v61 }
 0x8c0   :  { %793 = vrot.lane.b32.xlu0 %v3988_v37, %s3833_s0 }
 0x8cb   :  { %v1200_v13 = vpop.xlane.xlu1 %1199 }
 0x8cc   :  { %v1204_v14 = vmul.f32 0.03125, %v1200_v13 }
 0x8ce   :  { %v1206_v16 = vsub.f32 %v1194_v50, %v1204_v14 }
 0x8d0   :  { %v1208_v20 = vmul.f32 %v1206_v16, %v1206_v16 }
 0x8d2   :  { %v1210_v21 = vsel %vm70_vm0, %v1208_v20, 0.0 }
 0x92f   :  { %v790_v31 = vpop.xlane.xlu0 %789 }
 0x930   :  { %3734 = vrcp.f32 %v790_v31 }
 0x933   :  { %v957_v62 = vpop.xlane.xlu0 %956 }
 0x934   :  { %3736 = vrcp.f32 %v957_v62 }
 0x937   :  { %v794_v63 = vpop.permute.xlu0 %793 }
 0x938   :  { %3510 = vmatpush3.msra.mxu1 %v794_v63 }
 0x939   :  { %3519 = vmatprep.subr.mxu1 %v3829_v34 }
 0x93d   :  { %v3735_v0 = vpop.eup %3734 }
 0x93e   :  { %v792_v1 = vmul.f32 %v3735_v0, %v3731_v58  ;;  %v1351_v58 = vld [vmem:[%s4450_s12 + $0x8] sm:$0xff] }
 0x940   :  { %3512 = vmatmul.mubr.msk.f32.vlgmr.msra.gmra.mxu1 %vm297_vm3, %v792_v1 }
 0x941   :  { %v3737_v3 = vpop.eup %3736  ;;  %3520 = vmatpush3.msra.mxu1 %v961_v2  ;;  %3521 = vmatprep.mubr.msk.f32.mxu1 %vm3830_vm1, %v3829_v34 }
 0x942   :  { %v959_v4 = vmul.f32 %v3737_v3, %v3733_v60  ;;  %3531 = vmatprep.subr.mxu1 %v3829_v34  ;;  %v3275_v60 = vld [vmem:[%s4449_s11] ss:$0 sm:$0xff] }
 0x944   :  { %3522 = vmatmul.mubr.msk.f32.vlgmr.msra.gmra.mxu1 %vm297_vm3, %v959_v4 }
 0x945   :  { %3532 = vmatpush3.msra.mxu1 %v4044_v18  ;;  %3535 = vmatprep.mubr.msk.f32.mxu1 %vm3830_vm1, %v3829_v34 }
 0x946   :  { %3533 = vmatprep.subr.mxu1 %v3829_v34 }
 0x947   :  { %3534 = vmatpush3.msra.mxu1 %v4050_v19 }
 0x948   :  { %3549 = vmatprep.subr.mxu1 %v1357_v52 }
 0xa00   :  { %v865_v37 = vpop.f32.mrf.mxu1 }
 0xa01   :  { %3536 = vmatmul.mubr.msk.f32.vlgmr.msra.gmra.mxu1 %vm216_vm2, %v865_v37 }
 0xa02   :  { %v3513_v5 = vpop.f32.mrf.mxu1  ;;  %3550 = vmatpush3.msra.mxu1 %v1357_v52  ;;  %v3281_v52 = vld [vmem:[%s4452_s14] ss:$0 sm:$0xff] }
 0xa03   :  { %3551 = vmatprep.subr.mxu1 %v1356_v53 }
 0xa04   :  { %v1032_v6 = vpop.f32.mrf.mxu1  ;;  %3552 = vmatpush3.msra.mxu1 %v1356_v53 }
 0xa05   :  { %3529 = vmatmul.mubr.msk.f32.vlgmr.msra.gmra.mxu0 %vm216_vm2, %v1032_v6  ;;  %3553 = vmatprep.subr.mxu1 %v1355_v54 }
 0xa06   :  { %v3523_v7 = vpop.f32.mrf.mxu1  ;;  %3539 = vmatpush3.msra.mxu0 %v1243_v40  ;;  %3554 = vmatpush3.msra.mxu1 %v1355_v54 }
 0xa07   :  { %3540 = vmatprep.subr.mxu0 %v1242_v41  ;;  %3555 = vmatprep.subr.mxu1 %v1354_v55 }
 0xa08   :  { %3541 = vmatpush3.msra.mxu0 %v1242_v41  ;;  %3556 = vmatpush3.msra.mxu1 %v1354_v55  ;;  %v3285_v41 = vld [vmem:[%s4468_s26 + $0x30] sm:$0xff] }
 0xa09   :  { %3542 = vmatprep.subr.mxu0 %v1241_v42  ;;  %3557 = vmatprep.subr.mxu1 %v1353_v56 }
 0xa0a   :  { %3543 = vmatpush3.msra.mxu0 %v1241_v42  ;;  %3558 = vmatpush3.msra.mxu1 %v1353_v56  ;;  %v3284_v42 = vld [vmem:[%s4468_s26 + $0x28] sm:$0xff] }
 0xa0b   :  { %3544 = vmatprep.subr.mxu0 %v1240_v43  ;;  %3559 = vmatprep.subr.mxu1 %v1352_v57 }
 0xa0c   :  { %3545 = vmatpush3.msra.mxu0 %v1240_v43  ;;  %3560 = vmatpush3.msra.mxu1 %v1352_v57  ;;  %v3283_v43 = vld [vmem:[%s4468_s26 + $0x20] sm:$0xff] }
 0xa0d   :  { %3561 = vmatprep.subr.mxu1 %v1351_v58  ;;  %v3282_v57 = vld [vmem:[%s4453_s15] ss:$0 sm:$0xff] }
 0xa0e   :  { %3562 = vmatpush3.msra.mxu1 %v1351_v58 }
 0xa0f   :  { %3563 = vmatprep.subr.mxu1 %v1350_v59 }
 0xa10   :  { %3564 = vmatpush3.msra.mxu1 %v1350_v59 }
 0xa11   :  { %3584 = vmatprep.subr.mxu1 %v3829_v34 }
 0xac1   :  { %v1178_v8 = vpop.f32.mrf.mxu1 }
 0xac3   :  { %v3537_v9 = vpop.f32.mrf.mxu1 }
 0xac5   :  { %v1105_v10 = vpop.f32.mrf.mxu0 }
 0xac6   :  { %v1179_v11 = vadd.f32 %v1178_v8, %v1105_v10 }
 0xac7   :  { %v3530_v12 = vpop.f32.mrf.mxu0 }
 0xac8   :  { %1182 = vst.msk [vmem:[#allocation2 + $0x8] sm:$0xff] %vm70_vm0, %v1179_v11 }
 0xacf   :  { %v1184_v15 = vld [vmem:[#allocation2 + $0x8] sm:$0xff] }
 0xad0   :  { %v1193_v17 = vadd.f32 %v3272_v48, %v1184_v15 }
 0xad2   :  { %v1195_v18 = vadd.f32 %v1193_v17, %v3975_v33  ;;  %v3273_v33 = vld [vmem:[%s4446_s8] ss:$0 sm:$0xff] }
 0xad3   :  { %v3278_v17 = vld [vmem:[%s4451_s13] ss:$0 sm:$0xff] }
 0xad4   :  { %v1201_v19 = vsel %vm70_vm0, %v1195_v18, 0.0 }
 0xad5   :  { %1202 = vadd.xlane.f32.xlu0 %v1201_v19 }
 0xad9   :  { %1211 = vadd.xlane.f32.xlu0 %v1210_v21 }
 0xb5e   :  { %v1203_v22 = vpop.xlane.xlu0 %1202 }
 0xb5f   :  { %v1205_v23 = vmul.f32 0.03125, %v1203_v22 }
 0xb61   :  { %v1207_v24 = vsub.f32 %v1195_v18, %v1205_v23 }
 0xb62   :  { %v1212_v25 = vpop.xlane.xlu0 %1211 }
 0xb63   :  { %v1216_v26 = vmul.f32 0.03125, %v1212_v25  ;;  %v1209_v27 = vmul.f32 %v1207_v24, %v1207_v24 }
 0xb65   :  { %v1218_v28 = vadd.f32 1e-12, %v1216_v26  ;;  %v1213_v29 = vsel %vm70_vm0, %v1209_v27, 0.0 }
 0xb66   :  { %1214 = vadd.xlane.f32.xlu1 %v1213_v29 }
 0xb67   :  { %3738 = vrsqrt.f32 %v1218_v28 }
 0xb74   :  { %v3739_v30 = vpop.eup %3738 }
 0xb75   :  { %v1222_v35 = vmul.f32 %v3739_v30, %v1206_v16 }
 0xb77   :  { %v1230_v38 = vmul.f32 %v3273_v33, %v1222_v35 }
 0xb79   :  { %v4120_v39 = vadd.f32 %v3274_v36, %v1230_v38 }
 0xb7b   :  { %3546 = vmatprep.mubr.msk.f32.mxu0 %vm70_vm0, %v4120_v39 }
 0xbef   :  { %v1215_v44 = vpop.xlane.xlu1 %1214 }
 0xbf0   :  { %v1217_v46 = vmul.f32 0.03125, %v1215_v44 }
 0xbf2   :  { %v1219_v45 = vadd.f32 1e-12, %v1217_v46 }
 0xbf4   :  { %3740 = vrsqrt.f32 %v1219_v45 }
 0xc01   :  { %v3741_v48 = vpop.eup %3740 }
 0xc02   :  { %v1223_v49 = vmul.f32 %v3741_v48, %v1207_v24 }
 0xc04   :  { %v1231_v50 = vmul.f32 %v3273_v33, %v1223_v49 }
 0xc06   :  { %v1239_v51 = vadd.f32 %v3274_v36, %v1231_v50 }
 0xc08   :  { %3547 = vmatmul.mubr.msk.f32.vlgmr.msra.gmra.mxu0 %vm70_vm0, %v1239_v51 }
 0xcc8   :  { %v3548_v61 = vpop.f32.mrf.mxu0 }
 0xcc9   :  { %v1329_v31 = vadd.f32 %v3548_v61, %v3275_v60  ;;  %v3288_v61 = vld [vmem:[%s4443_s5 + $0x1] ss:$0 sm:$0xff] }
 0xcca   :  { %v1323_v62 = vpop.f32.mrf.mxu0 }
 0xccb   :  { %v1333_v63 = vmul.f32 %v1329_v31, %v1329_v31  ;;  %v1324_v0 = vadd.f32 %v3275_v60, %v1323_v62 }
 0xccd   :  { %v1335_v1 = vmul.f32 %v1333_v63, %v1329_v31  ;;  %v1332_v2 = vmul.f32 %v1324_v0, %v1324_v0 }
 0xccf   :  { %v1337_v3 = vmul.f32 0.044715, %v1335_v1  ;;  %v1334_v4 = vmul.f32 %v1332_v2, %v1324_v0 }
 0xcd1   :  { %v1339_v37 = vadd.f32 %v1337_v3, %v1329_v31  ;;  %v1336_v5 = vmul.f32 0.044715, %v1334_v4 }
 0xcd3   :  { %v1341_v6 = vmul.f32 0.7978846, %v1339_v37  ;;  %v1338_v7 = vadd.f32 %v1336_v5, %v1324_v0 }
 0xcd5   :  { %3742 = vtanh.f32 %v1341_v6  ;;  %v1340_v8 = vmul.f32 0.7978846, %v1338_v7 }
 0xcd7   :  { %3744 = vtanh.f32 %v1340_v8 }
 0xce2   :  { %v3743_v9 = vpop.eup %3742 }
 0xce3   :  { %v1345_v10 = vadd.f32 1.0, %v3743_v9 }
 0xce4   :  { %v3745_v11 = vpop.eup %3744 }
 0xce5   :  { %v1344_v12 = vadd.f32 1.0, %v3745_v11  ;;  %v1347_v13 = vmul.f32 0.5, %v1345_v10 }
 0xce7   :  { %v1346_v14 = vmul.f32 0.5, %v1344_v12  ;;  %v1349_v16 = vmul.f32 %v1347_v13, %v1329_v31 }
 0xce9   :  { %v1348_v15 = vmul.f32 %v1346_v14, %v1324_v0 }
 0xceb   :  { %3565 = vmatprep.mubr.msk.f32.mxu1 %vm1365_vm4, %v1348_v15 }
 0xcec   :  { %3566 = vmatmul.mubr.msk.f32.vlgmr.msra.gmra.mxu1 %vm1365_vm4, %v1349_v16 }
 0xced   :  { %3586 = vmatprep.mubr.msk.f32.mxu1 %vm3830_vm1, %v3829_v34 }
 0xdac   :  { %v3567_v18 = vpop.f32.mrf.mxu1 }
 0xdad   :  { %v1444_v19 = vadd.f32 %v3567_v18, %v3278_v17 }
 0xdae   :  { %v1438_v20 = vpop.f32.mrf.mxu1 }
 0xdaf   :  { %v1439_v21 = vadd.f32 %v3278_v17, %v1438_v20  ;;  %v1448_v22 = vadd.f32 %v1444_v19, %v1239_v51 }
 0xdb1   :  { %v1454_v23 = vsel %vm70_vm0, %v1448_v22, 0.0  ;;  %v1447_v24 = vadd.f32 %v1439_v21, %v4120_v39  ;;  %v3286_v39 = vld [vmem:[%s4468_s26 + $0x38] sm:$0xff] }
 0xdb2   :  { %1455 = vadd.xlane.f32.xlu1 %v1454_v23  ;;  %3568 = vmatprep.subr.mxu0 %v3286_v39 }
 0xdb3   :  { %v1451_v25 = vsel %vm70_vm0, %v1447_v24, 0.0  ;;  %3569 = vmatpush3.msra.mxu0 %v3286_v39 }
 0xdb4   :  { %1452 = vadd.xlane.f32.xlu0 %v1451_v25  ;;  %3570 = vmatprep.subr.mxu0 %v3285_v41 }
 0xdb5   :  { %3571 = vmatpush3.msra.mxu0 %v3285_v41 }
 0xdb6   :  { %3572 = vmatprep.subr.mxu0 %v3284_v42 }
 0xdb7   :  { %3573 = vmatpush3.msra.mxu0 %v3284_v42 }
 0xdb8   :  { %3574 = vmatprep.subr.mxu0 %v3283_v43 }
 0xdb9   :  { %3575 = vmatpush3.msra.mxu0 %v3283_v43 }
 0xdba   :  { %3579 = vmatprep.subr.mxu0 %v3829_v34 }
 0xe3b   :  { %v1456_v26 = vpop.xlane.xlu1 %1455 }
 0xe3c   :  { %v1458_v27 = vmul.f32 0.03125, %v1456_v26 }
 0xe3d   :  { %v1453_v28 = vpop.xlane.xlu0 %1452 }
 0xe3e   :  { %v1460_v29 = vsub.f32 %v1448_v22, %v1458_v27  ;;  %v1457_v30 = vmul.f32 0.03125, %v1453_v28 }
 0xe40   :  { %v1459_v33 = vsub.f32 %v1447_v24, %v1457_v30  ;;  %v1462_v35 = vmul.f32 %v1460_v29, %v1460_v29  ;;  %v4246_v30 = vld [vmem:[%s4444_s6 + $0x28] sm:$0xff] }
 0xe42   :  { %v1466_v36 = vsel %vm70_vm0, %v1462_v35, 0.0  ;;  %v1461_v38 = vmul.f32 %v1459_v33, %v1459_v33  ;;  %v3294_v35 = vld [vmem:[%s4444_s6 + $0x38] sm:$0xff] }
 0xe43   :  { %1467 = vadd.xlane.f32.xlu1 %v1466_v36  ;;  %v3293_v36 = vld [vmem:[%s4444_s6 + $0x30] sm:$0xff] }
 0xe44   :  { %v1463_v40 = vsel %vm70_vm0, %v1461_v38, 0.0 }
 0xe45   :  { %1464 = vadd.xlane.f32.xlu0 %v1463_v40 }
 0xecc   :  { %v1468_v44 = vpop.xlane.xlu1 %1467 }
 0xecd   :  { %v1470_v46 = vmul.f32 0.03125, %v1468_v44 }
 0xece   :  { %v1465_v45 = vpop.xlane.xlu0 %1464 }
 0xecf   :  { %v1472_v48 = vadd.f32 1e-12, %v1470_v46  ;;  %v1469_v49 = vmul.f32 0.03125, %v1465_v45 }
 0xed1   :  { %3746 = vrsqrt.f32 %v1472_v48  ;;  %v1471_v50 = vadd.f32 1e-12, %v1469_v49 }
 0xed3   :  { %3748 = vrsqrt.f32 %v1471_v50 }
 0xede   :  { %v3747_v51 = vpop.eup %3746 }
 0xedf   :  { %v1476_v53 = vmul.f32 %v3747_v51, %v1460_v29 }
 0xee0   :  { %v3749_v54 = vpop.eup %3748 }
 0xee1   :  { %v1475_v55 = vmul.f32 %v3749_v54, %v1459_v33  ;;  %v1484_v56 = vmul.f32 %v3281_v52, %v1476_v53  ;;  %v4256_v33 = vld [vmem:[%s4444_s6 + $0x20] sm:$0xff] }
 0xee3   :  { %v1483_v58 = vmul.f32 %v3281_v52, %v1475_v55  ;;  %v4198_v60 = vadd.f32 %v3282_v57, %v1484_v56 }
 0xee5   :  { %v4196_v59 = vadd.f32 %v3282_v57, %v1483_v58 }
 0xee7   :  { %3576 = vmatprep.mubr.msk.f32.mxu0 %vm70_vm0, %v4196_v59 }
 0xee8   :  { %3577 = vmatmul.mubr.msk.f32.vlgmr.msra.gmra.mxu0 %vm70_vm0, %v4198_v60 }
 0xee9   :  { %3581 = vmatprep.mubr.msk.f32.mxu0 %vm3830_vm1, %v3829_v34 }
 0xfa8   :  { %v3578_v31 = vpop.f32.mrf.mxu0 }
 0xfa9   :  { %v4209_v62 = vadd.f32 %v3578_v31, %v3288_v61 }
 0xfaa   :  { %v1578_v63 = vpop.f32.mrf.mxu0 }
 0xfab   :  { %v1579_v0 = vadd.f32 %v3288_v61, %v1578_v63 }
 0xfad   :  { %1760 = vrot.lane.b32.xlu1 %v1579_v0, %s3832_s28  ;;  %1593 = vrot.lane.b32.xlu0 %v1579_v0, %s3831_s27 }
 0xfb1   :  { %1758 = vrot.lane.b32.xlu1 %v1579_v0, %s3834_s21 }
0x101f   :  { %v1594_v1 = vpop.permute.xlu0 %1593  ;;  %v1761_v2 = vpop.permute.xlu1 %1760 }
0x1020   :  { %3580 = vmatpush3.xpose.msk.msra.mxu0 %vm216_vm2, %v1594_v1 }
0x1021   :  { %3589 = vmatprep.subr.mxu0 %v3829_v34 }
0x1023   :  { %3582 = vmatmul.mubr.msk.f32.vlgmr.msra.gmra.mxu0 %vm216_vm2, %v1579_v0  ;;  %v1759_v3 = vpop.permute.xlu1 %1758 }
0x1024   :  { %3590 = vmatpush3.xpose.msk.msra.mxu0 %vm216_vm2, %v1761_v2  ;;  %3591 = vmatprep.mubr.msk.f32.mxu0 %vm3830_vm1, %v3829_v34 }
0x1025   :  { %3599 = vmatprep.subr.mxu0 %v3829_v34 }
0x1027   :  { %3592 = vmatmul.mubr.msk.f32.vlgmr.msra.gmra.mxu0 %vm216_vm2, %v1759_v3 }
0x1028   :  { %3603 = vmatprep.mubr.msk.f32.mxu0 %vm3830_vm1, %v3829_v34  ;;  %3600 = vmatpush3.msra.mxu0 %v3294_v35 }
0x1029   :  { %3601 = vmatprep.subr.mxu0 %v3829_v34 }
0x102a   :  { %3602 = vmatpush3.msra.mxu0 %v3293_v36 }
0x102b   :  { %3613 = vmatprep.subr.mxu0 %v3829_v34 }
0x10e3   :  { %v1665_v4 = vpop.f32.mrf.mxu0 }
0x10e4   :  { %v1669_v37 = vmul.f32 0.25, %v1665_v4 }
0x10e5   :  { %v3583_v5 = vpop.f32.mrf.mxu0 }
0x10e6   :  { %v1670_v6 = vadd.f32 %v1669_v37, %v4006_v47 }
0x10e7   :  { %v1832_v7 = vpop.f32.mrf.mxu0 }
0x10e8   :  { %v1836_v8 = vmul.f32 0.25, %v1832_v7  ;;  %v1671_v9 = vsel %vm297_vm3, %v1670_v6, -inf }
0x10e9   :  { %1672 = vmax.xlane.f32.xlu1 %v1671_v9  ;;  %v3593_v10 = vpop.f32.mrf.mxu0 }
0x10ea   :  { %v1837_v11 = vadd.f32 %v1836_v8, %v4006_v47 }
0x10ec   :  { %v1838_v12 = vsel %vm297_vm3, %v1837_v11, -inf }
0x10ed   :  { %1839 = vmax.xlane.f32.xlu0 %v1838_v12 }
0x10fa   :  { %1682 = vrot.lane.b32.xlu1 %v1579_v0, %s3833_s0 }
0x10fe   :  { %2073 = vrot.lane.b32.xlu1 %v4209_v62, %s3831_s27 }
0x1102   :  { %2240 = vrot.lane.b32.xlu1 %v4209_v62, %s3832_s28 }
0x1106   :  { %2238 = vrot.lane.b32.xlu1 %v4209_v62, %s3834_s21 }
0x1172   :  { %v1673_v13 = vpop.xlane.xlu1 %1672 }
0x1173   :  { %v1674_v14 = vsub.f32 %v1670_v6, %v1673_v13 }
0x1175   :  { %v1675_v15 = vmul.f32 1.442695, %v1674_v14 }
0x1176   :  { %v1683_v16 = vpop.permute.xlu1 %1682  ;;  %v1840_v17 = vpop.xlane.xlu0 %1839 }
0x1177   :  { %3750 = vpow2.f32 %v1675_v15  ;;  %v1841_v47 = vsub.f32 %v1837_v11, %v1840_v17  ;;  %3585 = vmatpush3.msra.mxu1 %v1683_v16 }
0x1178   :  { %3594 = vmatprep.subr.mxu1 %v3829_v34 }
0x1179   :  { %v1842_v18 = vmul.f32 1.442695, %v1841_v47 }
0x117a   :  { %v2074_v38 = vpop.permute.xlu1 %2073 }
0x117b   :  { %3752 = vpow2.f32 %v1842_v18 }
0x117e   :  { %v2241_v42 = vpop.permute.xlu1 %2240 }
0x1182   :  { %v2239_v44 = vpop.permute.xlu1 %2238 }
0x1184   :  { %v3751_v19 = vpop.eup %3750 }
0x1185   :  { %v1677_v20 = vsel %vm297_vm3, %v3751_v19, 0.0 }
0x1186   :  { %1678 = vadd.xlane.f32.xlu0 %v1677_v20 }
0x1188   :  { %v3753_v21 = vpop.eup %3752 }
0x1189   :  { %v1844_v22 = vsel %vm297_vm3, %v3753_v21, 0.0 }
0x118a   :  { %1845 = vadd.xlane.f32.xlu0 %v1844_v22 }
0x11a0   :  { %1849 = vrot.lane.b32.xlu0 %v1579_v0, %s3835_s1  ;;  %v3312_v0 = vld [vmem:[%s4445_s7 + $0x1] ss:$0 sm:$0xff] }
0x120f   :  { %v1679_v23 = vpop.xlane.xlu0 %1678 }
0x1210   :  { %3754 = vrcp.f32 %v1679_v23 }
0x1213   :  { %v1846_v24 = vpop.xlane.xlu0 %1845 }
0x1214   :  { %3756 = vrcp.f32 %v1846_v24 }
0x1217   :  { %v1850_v27 = vpop.permute.xlu0 %1849 }
0x121d   :  { %v3755_v25 = vpop.eup %3754 }
0x121e   :  { %v1681_v26 = vmul.f32 %v3755_v25, %v3751_v19 }
0x1220   :  { %3587 = vmatmul.mubr.msk.f32.vlgmr.msra.gmra.mxu1 %vm297_vm3, %v1681_v26 }
0x1221   :  { %v3757_v28 = vpop.eup %3756  ;;  %3595 = vmatpush3.msra.mxu1 %v1850_v27  ;;  %3596 = vmatprep.mubr.msk.f32.mxu1 %vm3830_vm1, %v3829_v34 }
0x1222   :  { %v1848_v29 = vmul.f32 %v3757_v28, %v3753_v21  ;;  %3606 = vmatprep.subr.mxu1 %v3829_v34 }
0x1224   :  { %3597 = vmatmul.mubr.msk.f32.vlgmr.msra.gmra.mxu1 %vm297_vm3, %v1848_v29 }
0x1225   :  { %3607 = vmatpush3.msra.mxu1 %v4246_v30  ;;  %3610 = vmatprep.mubr.msk.f32.mxu1 %vm3830_vm1, %v3829_v34 }
0x1226   :  { %3608 = vmatprep.subr.mxu1 %v3829_v34 }
0x1227   :  { %3609 = vmatpush3.msra.mxu1 %v4256_v33 }
0x1228   :  { %3618 = vmatprep.subr.mxu1 %v3829_v34 }
0x12e0   :  { %v1754_v40 = vpop.f32.mrf.mxu1 }
0x12e1   :  { %3611 = vmatmul.mubr.msk.f32.vlgmr.msra.gmra.mxu1 %vm216_vm2, %v1754_v40 }
0x12e2   :  { %v3588_v39 = vpop.f32.mrf.mxu1  ;;  %3620 = vmatprep.mubr.msk.f32.mxu1 %vm3830_vm1, %v3829_v34 }
0x12e4   :  { %v1921_v41 = vpop.f32.mrf.mxu1 }
0x12e5   :  { %3604 = vmatmul.mubr.msk.f32.vlgmr.msra.gmra.mxu0 %vm216_vm2, %v1921_v41 }
0x12e6   :  { %3614 = vmatpush3.xpose.msk.msra.mxu0 %vm216_vm2, %v2074_v38  ;;  %v3598_v43 = vpop.f32.mrf.mxu1  ;;  %3615 = vmatprep.mubr.msk.f32.mxu0 %vm3830_vm1, %v3829_v34 }
0x12e7   :  { %3623 = vmatprep.subr.mxu0 %v3829_v34 }
0x12e9   :  { %3616 = vmatmul.mubr.msk.f32.vlgmr.msra.gmra.mxu0 %vm216_vm2, %v4209_v62 }
0x12ea   :  { %3624 = vmatpush3.xpose.msk.msra.mxu0 %vm216_vm2, %v2241_v42  ;;  %3625 = vmatprep.mubr.msk.f32.mxu0 %vm3830_vm1, %v3829_v34 }
0x12eb   :  { %3633 = vmatprep.subr.mxu0 %v3829_v34 }
0x12ed   :  { %3626 = vmatmul.mubr.msk.f32.vlgmr.msra.gmra.mxu0 %vm216_vm2, %v2239_v44 }
0x12ee   :  { %3634 = vmatpush3.msra.mxu0 %v3294_v35  ;;  %3637 = vmatprep.mubr.msk.f32.mxu0 %vm3830_vm1, %v3829_v34 }
0x12ef   :  { %3635 = vmatprep.subr.mxu0 %v3829_v34 }
0x12f0   :  { %3636 = vmatpush3.msra.mxu0 %v3293_v36 }
0x13a1   :  { %v2067_v46 = vpop.f32.mrf.mxu1 }
0x13a3   :  { %v3612_v45 = vpop.f32.mrf.mxu1 }
0x13a5   :  { %v1994_v48 = vpop.f32.mrf.mxu0 }
0x13a6   :  { %v2068_v49 = vadd.f32 %v2067_v46, %v1994_v48 }
0x13a7   :  { %v3605_v50 = vpop.f32.mrf.mxu0 }
0x13a8   :  { %2071 = vst.msk [vmem:[#allocation2] sm:$0xff] %vm70_vm0, %v2068_v49  ;;  %v3316_v50 = vld [vmem:[%s4447_s9 + $0x1] ss:$0 sm:$0xff] }
0x13a9   :  { %v2145_v51 = vpop.f32.mrf.mxu0 }
0x13aa   :  { %v2149_v52 = vmul.f32 0.25, %v2145_v51 }
0x13ab   :  { %v3617_v53 = vpop.f32.mrf.mxu0 }
0x13ac   :  { %v2150_v54 = vadd.f32 %v2149_v52, %v4079_v32  ;;  %v3320_v53 = vld [vmem:[%s4448_s10 + $0x38] sm:$0xff] }
0x13ad   :  { %v2312_v55 = vpop.f32.mrf.mxu0  ;;  %3647 = vmatprep.subr.mxu0 %v3320_v53 }
0x13ae   :  { %v2316_v56 = vmul.f32 0.25, %v2312_v55  ;;  %v2151_v57 = vsel %vm297_vm3, %v2150_v54, -inf  ;;  %v3318_v55 = vld [vmem:[%s4448_s10 + $0x28] sm:$0xff] }
0x13af   :  { %2152 = vmax.xlane.f32.xlu0 %v2151_v57  ;;  %v3627_v58 = vpop.f32.mrf.mxu0  ;;  %v2552_v63 = vld [vmem:[#allocation2] sm:$0xff] }
0x13b0   :  { %v2317_v61 = vadd.f32 %v2316_v56, %v4079_v32  ;;  %v2562_v1 = vadd.f32 %v3312_v0, %v2552_v63  ;;  %v3317_v56 = vld [vmem:[%s4448_s10 + $0x20] sm:$0xff] }
0x13b2   :  { %v2318_v31 = vsel %vm297_vm3, %v2317_v61, -inf  ;;  %v2564_v2 = vadd.f32 %v2562_v1, %v4196_v59 }
0x13b3   :  { %2319 = vmax.xlane.f32.xlu1 %v2318_v31 }
0x13b4   :  { %v2570_v3 = vsel %vm70_vm0, %v2564_v2, 0.0 }
0x13c4   :  { %2329 = vrot.lane.b32.xlu1 %v4209_v62, %s3835_s1 }
0x13e8   :  { %2571 = vadd.xlane.f32.xlu1 %v2570_v3  ;;  %v3331_v3 = vld [vmem:[%s4450_s12 + $0x70] sm:$0xff] }
0x1438   :  { %v2153_v4 = vpop.xlane.xlu0 %2152 }
0x1439   :  { %v2154_v37 = vsub.f32 %v2150_v54, %v2153_v4  ;;  %v3319_v54 = vld [vmem:[%s4448_s10 + $0x30] sm:$0xff]  ;;  %v3330_v4 = vld [vmem:[%s4450_s12 + $0x68] sm:$0xff] }
0x143b   :  { %v2155_v32 = vmul.f32 1.442695, %v2154_v37  ;;  %v3329_v37 = vld [vmem:[%s4450_s12 + $0x60] sm:$0xff] }
0x143c   :  { %v2320_v5 = vpop.xlane.xlu1 %2319 }
0x143d   :  { %3758 = vpow2.f32 %v2155_v32  ;;  %v2321_v6 = vsub.f32 %v2317_v61, %v2320_v5  ;;  %v3328_v32 = vld [vmem:[%s4450_s12 + $0x58] sm:$0xff]  ;;  %v3327_v5 = vld [vmem:[%s4450_s12 + $0x50] sm:$0xff] }
0x143f   :  { %v2322_v7 = vmul.f32 1.442695, %v2321_v6  ;;  %v3326_v6 = vld [vmem:[%s4450_s12 + $0x48] sm:$0xff] }
0x1440   :  { %v2330_v16 = vpop.permute.xlu1 %2329 }
0x1441   :  { %3760 = vpow2.f32 %v2322_v7  ;;  %v3325_v7 = vld [vmem:[%s4450_s12 + $0x40] sm:$0xff] }
0x144a   :  { %v3759_v8 = vpop.eup %3758 }
0x144b   :  { %v2157_v9 = vsel %vm297_vm3, %v3759_v8, 0.0 }
0x144c   :  { %2158 = vadd.xlane.f32.xlu0 %v2157_v9 }
0x144e   :  { %v3761_v10 = vpop.eup %3760 }
0x144f   :  { %v2324_v11 = vsel %vm297_vm3, %v3761_v10, 0.0 }
0x1450   :  { %2325 = vadd.xlane.f32.xlu0 %v2324_v11 }
0x1466   :  { %2162 = vrot.lane.b32.xlu0 %v4209_v62, %s3833_s0 }
0x1471   :  { %v2572_v26 = vpop.xlane.xlu1 %2571 }
0x1472   :  { %v2576_v27 = vmul.f32 0.03125, %v2572_v26 }
0x1474   :  { %v2578_v29 = vsub.f32 %v2564_v2, %v2576_v27  ;;  %v3332_v2 = vld [vmem:[%s4450_s12 + $0x78] sm:$0xff] }
0x1476   :  { %v2580_v36 = vmul.f32 %v2578_v29, %v2578_v29 }
0x1478   :  { %v2582_v38 = vsel %vm70_vm0, %v2580_v36, 0.0 }
0x14d5   :  { %v2159_v59 = vpop.xlane.xlu0 %2158 }
0x14d6   :  { %3762 = vrcp.f32 %v2159_v59 }
0x14d9   :  { %v2326_v12 = vpop.xlane.xlu0 %2325 }
0x14da   :  { %3764 = vrcp.f32 %v2326_v12 }
0x14dd   :  { %v2163_v13 = vpop.permute.xlu0 %2162 }
0x14de   :  { %3619 = vmatpush3.msra.mxu1 %v2163_v13 }
0x14df   :  { %3628 = vmatprep.subr.mxu1 %v3829_v34 }
0x14e3   :  { %v3763_v14 = vpop.eup %3762 }
0x14e4   :  { %v2161_v15 = vmul.f32 %v3763_v14, %v3759_v8  ;;  %v3322_v8 = vld [vmem:[%s4449_s11 + $0x1] ss:$0 sm:$0xff] }
0x14e6   :  { %3621 = vmatmul.mubr.msk.f32.vlgmr.msra.gmra.mxu1 %vm297_vm3, %v2161_v15 }
0x14e7   :  { %v3765_v17 = vpop.eup %3764  ;;  %3629 = vmatpush3.msra.mxu1 %v2330_v16  ;;  %3630 = vmatprep.mubr.msk.f32.mxu1 %vm3830_vm1, %v3829_v34 }
0x14e8   :  { %v2328_v47 = vmul.f32 %v3765_v17, %v3761_v10  ;;  %3640 = vmatprep.subr.mxu1 %v3829_v34 }
0x14ea   :  { %3631 = vmatmul.mubr.msk.f32.vlgmr.msra.gmra.mxu1 %vm297_vm3, %v2328_v47 }
0x14eb   :  { %3641 = vmatpush3.msra.mxu1 %v4246_v30  ;;  %3644 = vmatprep.mubr.msk.f32.mxu1 %vm3830_vm1, %v3829_v34 }
0x14ec   :  { %3642 = vmatprep.subr.mxu1 %v3829_v34 }
0x14ed   :  { %3643 = vmatpush3.msra.mxu1 %v4256_v33 }
0x14ee   :  { %3658 = vmatprep.subr.mxu1 %v3332_v2 }
0x15a6   :  { %v2234_v62 = vpop.f32.mrf.mxu1 }
0x15a7   :  { %3645 = vmatmul.mubr.msk.f32.vlgmr.msra.gmra.mxu1 %vm216_vm2, %v2234_v62 }
0x15a8   :  { %v3622_v18 = vpop.f32.mrf.mxu1  ;;  %3659 = vmatpush3.msra.mxu1 %v3332_v2 }
0x15a9   :  { %3660 = vmatprep.subr.mxu1 %v3331_v3 }
0x15aa   :  { %v2401_v19 = vpop.f32.mrf.mxu1  ;;  %3661 = vmatpush3.msra.mxu1 %v3331_v3 }
0x15ab   :  { %3638 = vmatmul.mubr.msk.f32.vlgmr.msra.gmra.mxu0 %vm216_vm2, %v2401_v19  ;;  %3662 = vmatprep.subr.mxu1 %v3330_v4 }
0x15ac   :  { %v3632_v20 = vpop.f32.mrf.mxu1  ;;  %3648 = vmatpush3.msra.mxu0 %v3320_v53  ;;  %3663 = vmatpush3.msra.mxu1 %v3330_v4 }
0x15ad   :  { %3649 = vmatprep.subr.mxu0 %v3319_v54  ;;  %3664 = vmatprep.subr.mxu1 %v3329_v37 }
0x15ae   :  { %3650 = vmatpush3.msra.mxu0 %v3319_v54  ;;  %3665 = vmatpush3.msra.mxu1 %v3329_v37 }
0x15af   :  { %3651 = vmatprep.subr.mxu0 %v3318_v55  ;;  %3666 = vmatprep.subr.mxu1 %v3328_v32 }
0x15b0   :  { %3652 = vmatpush3.msra.mxu0 %v3318_v55  ;;  %3667 = vmatpush3.msra.mxu1 %v3328_v32 }
0x15b1   :  { %3653 = vmatprep.subr.mxu0 %v3317_v56  ;;  %3668 = vmatprep.subr.mxu1 %v3327_v5 }
0x15b2   :  { %3654 = vmatpush3.msra.mxu0 %v3317_v56  ;;  %3669 = vmatpush3.msra.mxu1 %v3327_v5 }
0x15b3   :  { %3677 = vmatprep.subr.mxu0 %v3829_v34  ;;  %3670 = vmatprep.subr.mxu1 %v3326_v6 }
0x15b4   :  { %3671 = vmatpush3.msra.mxu1 %v3326_v6  ;;  %v2953_v6 = vld [vmem:[%s4454_s16 + $0x18] sm:$0xff] }
0x15b5   :  { %3672 = vmatprep.subr.mxu1 %v3325_v7 }
0x15b6   :  { %3673 = vmatpush3.msra.mxu1 %v3325_v7  ;;  %v2952_v7 = vld [vmem:[%s4454_s16 + $0x10] sm:$0xff] }
0x15b7   :  { %3693 = vmatprep.subr.mxu1 %v3829_v34 }
0x1667   :  { %v2547_v21 = vpop.f32.mrf.mxu1 }
0x1669   :  { %v3646_v22 = vpop.f32.mrf.mxu1 }
0x166b   :  { %v2474_v23 = vpop.f32.mrf.mxu0 }
0x166c   :  { %v2548_v24 = vadd.f32 %v2547_v21, %v2474_v23 }
0x166d   :  { %v3639_v25 = vpop.f32.mrf.mxu0 }
0x166e   :  { %2551 = vst.msk [vmem:[#allocation2 + $0x8] sm:$0xff] %vm70_vm0, %v2548_v24 }
0x1675   :  { %v2553_v28 = vld [vmem:[#allocation2 + $0x8] sm:$0xff] }
0x1676   :  { %v2563_v30 = vadd.f32 %v3312_v0, %v2553_v28  ;;  %v3334_v28 = vld [vmem:[%s4451_s13 + $0x1] ss:$0 sm:$0xff] }
0x1678   :  { %v2565_v33 = vadd.f32 %v2563_v30, %v4198_v60  ;;  %v3315_v60 = vld [vmem:[%s4446_s8 + $0x1] ss:$0 sm:$0xff] }
0x167a   :  { %v2573_v35 = vsel %vm70_vm0, %v2565_v33, 0.0 }
0x167b   :  { %2574 = vadd.xlane.f32.xlu0 %v2573_v35 }
0x167f   :  { %2583 = vadd.xlane.f32.xlu0 %v2582_v38 }
0x1704   :  { %v2575_v40 = vpop.xlane.xlu0 %2574 }
0x1705   :  { %v2577_v39 = vmul.f32 0.03125, %v2575_v40 }
0x1707   :  { %v2579_v41 = vsub.f32 %v2565_v33, %v2577_v39 }
0x1708   :  { %v2584_v42 = vpop.xlane.xlu0 %2583 }
0x1709   :  { %v2588_v43 = vmul.f32 0.03125, %v2584_v42  ;;  %v2581_v44 = vmul.f32 %v2579_v41, %v2579_v41 }
0x170b   :  { %v2590_v46 = vadd.f32 1e-12, %v2588_v43  ;;  %v2585_v45 = vsel %vm70_vm0, %v2581_v44, 0.0 }
0x170c   :  { %2586 = vadd.xlane.f32.xlu1 %v2585_v45 }
0x170d   :  { %3766 = vrsqrt.f32 %v2590_v46 }
0x171a   :  { %v3767_v48 = vpop.eup %3766 }
0x171b   :  { %v2594_v49 = vmul.f32 %v3767_v48, %v2578_v29 }
0x171d   :  { %v2602_v51 = vmul.f32 %v3315_v60, %v2594_v49 }
0x171f   :  { %v4326_v52 = vadd.f32 %v3316_v50, %v2602_v51  ;;  %v3784_v51 = vld [vmem:[%s4471_s30] sm:$0x3] }
0x1720   :  { %v3030_v4 = vrot.slane %v3784_v51, 1 }
0x1721   :  { %3655 = vmatprep.mubr.msk.f32.mxu0 %vm70_vm0, %v4326_v52 }
0x1795   :  { %v2587_v57 = vpop.xlane.xlu1 %2586 }
0x1796   :  { %v2589_v58 = vmul.f32 0.03125, %v2587_v57 }
0x1798   :  { %v2591_v61 = vadd.f32 1e-12, %v2589_v58 }
0x179a   :  { %3768 = vrsqrt.f32 %v2591_v61 }
0x17a7   :  { %v3769_v31 = vpop.eup %3768 }
0x17a8   :  { %v2595_v63 = vmul.f32 %v3769_v31, %v2579_v41  ;;  %v3339_v31 = vld [vmem:[%s4452_s14 + $0x1] ss:$0 sm:$0xff] }
0x17aa   :  { %v2603_v0 = vmul.f32 %v3315_v60, %v2595_v63 }
0x17ac   :  { %v2611_v1 = vadd.f32 %v3316_v50, %v2603_v0 }
0x17ae   :  { %3656 = vmatmul.mubr.msk.f32.vlgmr.msra.gmra.mxu0 %vm70_vm0, %v2611_v1 }
0x17af   :  { %3679 = vmatprep.mubr.msk.f32.mxu0 %vm3830_vm1, %v3829_v34 }
0x186e   :  { %v3657_v9 = vpop.f32.mrf.mxu0 }
0x186f   :  { %v2703_v10 = vadd.f32 %v3657_v9, %v3322_v8  ;;  %v2950_v9 = vld [vmem:[%s4454_s16] sm:$0xff] }
0x1870   :  { %v2697_v11 = vpop.f32.mrf.mxu0 }
0x1871   :  { %v2707_v59 = vmul.f32 %v2703_v10, %v2703_v10  ;;  %v2698_v12 = vadd.f32 %v3322_v8, %v2697_v11  ;;  %v2951_v8 = vld [vmem:[%s4454_s16 + $0x8] sm:$0xff] }
0x1873   :  { %v2709_v13 = vmul.f32 %v2707_v59, %v2703_v10  ;;  %v2706_v14 = vmul.f32 %v2698_v12, %v2698_v12 }
0x1875   :  { %v2711_v15 = vmul.f32 0.044715, %v2709_v13  ;;  %v2708_v16 = vmul.f32 %v2706_v14, %v2698_v12 }
0x1877   :  { %v2713_v17 = vadd.f32 %v2711_v15, %v2703_v10  ;;  %v2710_v47 = vmul.f32 0.044715, %v2708_v16 }
0x1879   :  { %v2715_v62 = vmul.f32 0.7978846, %v2713_v17  ;;  %v2712_v18 = vadd.f32 %v2710_v47, %v2698_v12  ;;  %v2954_v47 = vld [vmem:[%s4455_s17] sm:$0x1] }
0x187b   :  { %3770 = vtanh.f32 %v2715_v62  ;;  %v2714_v19 = vmul.f32 0.7978846, %v2712_v18 }
0x187d   :  { %3772 = vtanh.f32 %v2714_v19 }
0x1888   :  { %v3771_v20 = vpop.eup %3770 }
0x1889   :  { %v2719_v21 = vadd.f32 1.0, %v3771_v20  ;;  %v3111_v20 = vld [vmem:[%s4455_s17] sm:$0x1]  ;;  %s3836_s17 = smov [#allocation3]  }
0x188a   :  { %v3773_v22 = vpop.eup %3772  ;;  %s3229_s3 = sshll.u32 %s3836_s17, 4  ;;  %s3230_s3 = int_to_ptr.vmem [resolvable:$true] %s3229_s3 }
0x188b   :  { %v2718_v23 = vadd.f32 1.0, %v3773_v22  ;;  %v2721_v24 = vmul.f32 0.5, %v2719_v21  ;;  %s3785_s4 = scalar_lea.vmem %s3230_s3, 32  ;;  %p3790_p1 = scmp.lt.s32.totalorder %s3230_s3, %s3230_s3 }
0x188c   :  { %p3786_p0 = scmp.ne.s32.totalorder %s3230_s3, %s3785_s4  ;;  %p3791_p2 = scmp.lt.s32.totalorder %s3785_s4, %s3785_s4 }
0x188d   :  { %v2720_v25 = vmul.f32 0.5, %v2718_v23  ;;  %v2723_v27 = vmul.f32 %v2721_v24, %v2703_v10 }
0x188e   :  { %p3792_p3 = por %p3791_p2, %p3790_p1 }
0x188f   :  { %v2722_v26 = vmul.f32 %v2720_v25, %v2698_v12 }
0x1890   :  { %p3793_p4 = pnand %p3792_p3, %p3786_p0 }
0x1891   :  { %3674 = vmatprep.mubr.msk.f32.mxu1 %vm1365_vm4, %v2722_v26 }
0x1892   :  { %3675 = vmatmul.mubr.msk.f32.vlgmr.msra.gmra.mxu1 %vm1365_vm4, %v2723_v27 }
0x1893   :  { %3695 = vmatprep.mubr.msk.f32.mxu1 %vm3830_vm1, %v3829_v34 }
0x1952   :  { %v3676_v29 = vpop.f32.mrf.mxu1 }
0x1953   :  { %v2819_v30 = vadd.f32 %v3676_v29, %v3334_v28 }
0x1954   :  { %v2813_v33 = vpop.f32.mrf.mxu1 }
0x1955   :  { %v2814_v35 = vadd.f32 %v3334_v28, %v2813_v33  ;;  %v2823_v36 = vadd.f32 %v2819_v30, %v2611_v1  ;;  %v3340_v1 = vld [vmem:[%s4453_s15 + $0x1] ss:$0 sm:$0xff] }
0x1956   :  { %v3187_v30 = vld [vmem:[%s4456_s18] sm:$0x3] }
0x1957   :  { %v2831_v38 = vsel %vm70_vm0, %v2823_v36, 0.0  ;;  %v2822_v40 = vadd.f32 %v2814_v35, %v4326_v52  ;;  %v2871_v52 = vsel %vm2870_vm5, %v3784_v51, 0.0 }
0x1958   :  { %2832 = vadd.xlane.f32.xlu1 %v2831_v38 }
0x1959   :  { %v2828_v39 = vsel %vm70_vm0, %v2822_v40, 0.0 }
0x195a   :  { %2829 = vadd.xlane.f32.xlu0 %v2828_v39 }
0x19e1   :  { %v2833_v41 = vpop.xlane.xlu1 %2832 }
0x19e2   :  { %v2835_v42 = vmul.f32 0.03125, %v2833_v41 }
0x19e3   :  { %v2830_v43 = vpop.xlane.xlu0 %2829 }
0x19e4   :  { %v2837_v44 = vsub.f32 %v2823_v36, %v2835_v42  ;;  %v2834_v46 = vmul.f32 0.03125, %v2830_v43 }
0x19e6   :  { %v2836_v45 = vsub.f32 %v2822_v40, %v2834_v46  ;;  %v2839_v48 = vmul.f32 %v2837_v44, %v2837_v44 }
0x19e8   :  { %v2843_v60 = vsel %vm70_vm0, %v2839_v48, 0.0  ;;  %v2838_v49 = vmul.f32 %v2836_v45, %v2836_v45 }
0x19e9   :  { %2844 = vadd.xlane.f32.xlu1 %v2843_v60 }
0x19ea   :  { %v2840_v50 = vsel %vm70_vm0, %v2838_v49, 0.0 }
0x19eb   :  { %2841 = vadd.xlane.f32.xlu0 %v2840_v50 }
0x19ef   :  { %2872 = vadd.xlane.f32.xlu0 %v2871_v52 }
0x1a72   :  { %v2845_v53 = vpop.xlane.xlu1 %2844 }
0x1a73   :  { %v2847_v54 = vmul.f32 0.03125, %v2845_v53 }
0x1a74   :  { %v2842_v55 = vpop.xlane.xlu0 %2841 }
0x1a75   :  { %v2849_v56 = vadd.f32 1e-12, %v2847_v54  ;;  %v2846_v57 = vmul.f32 0.03125, %v2842_v55 }
0x1a77   :  { %3774 = vrsqrt.f32 %v2849_v56  ;;  %v2848_v58 = vadd.f32 1e-12, %v2846_v57 }
0x1a78   :  { %v2873_v10 = vpop.xlane.xlu0 %2872 }
0x1a79   :  { %3776 = vrsqrt.f32 %v2848_v58 }
0x1a7a   :  { %3778 = vrcp.f32 %v2873_v10 }
0x1a84   :  { %v3775_v61 = vpop.eup %3774 }
0x1a85   :  { %v2853_v63 = vmul.f32 %v3775_v61, %v2837_v44 }
0x1a86   :  { %v3777_v0 = vpop.eup %3776 }
0x1a87   :  { %v2861_v2 = vmul.f32 %v3339_v31, %v2853_v63  ;;  %v2852_v3 = vmul.f32 %v3777_v0, %v2836_v45  ;;  %v3779_v11 = vpop.eup %3778 }
0x1a88   :  { %v3104_v16 = vrot.slane %v3779_v11, 1 }
0x1a89   :  { %v2869_v37 = vadd.f32 %v3340_v1, %v2861_v2  ;;  %v2860_v32 = vmul.f32 %v3339_v31, %v2852_v3 }
0x1a8b   :  { %3694 = vmatpush3.msra.mxu1 %v2869_v37  ;;  %v2868_v5 = vadd.f32 %v3340_v1, %v2860_v32 }
0x1a8c   :  { %3696 = vmatmul.mubr.msk.f32.vlgmr.msra.gmra.mxu1 %vm297_vm3, %v3030_v4 }
0x1a8d   :  { %3678 = vmatpush3.msra.mxu0 %v2868_v5 }
0x1a8e   :  { %3680 = vmatmul.mubr.msk.f32.vlgmr.msra.gmra.mxu0 %vm297_vm3, %v3784_v51  ;;  %3682 = vmatprep.subr.mxu0 %v3829_v34 }
0x1a8f   :  { %3683 = vmatpush3.msra.mxu0 %v2953_v6  ;;  %3690 = vmatprep.mubr.msk.f32.mxu0 %vm3830_vm1, %v3829_v34 }
0x1a90   :  { %3684 = vmatprep.subr.mxu0 %v3829_v34 }
0x1a91   :  { %3685 = vmatpush3.msra.mxu0 %v2952_v7 }
0x1a92   :  { %3686 = vmatprep.subr.mxu0 %v3829_v34 }
0x1a93   :  { %3687 = vmatpush3.msra.mxu0 %v2951_v8 }
0x1a94   :  { %3688 = vmatprep.subr.mxu0 %v3829_v34 }
0x1a95   :  { %3689 = vmatpush3.msra.mxu0 %v2950_v9 }
0x1a96   :  { %3698 = vmatprep.subr.mxu0 %v3829_v34 }
0x1b4c   :  { %v3099_v59 = vpop.f32.mrf.mxu1 }
0x1b4d   :  { %v3106_v17 = vmul.f32 %v3104_v16, %v3099_v59 }
0x1b4e   :  { %v2945_v12 = vpop.f32.mrf.mxu0  ;;  %v3697_v13 = vpop.f32.mrf.mxu1 }
0x1b4f   :  { %v2949_v14 = vmul.f32 %v3779_v11, %v2945_v12 }
0x1b50   :  { %v3681_v15 = vpop.f32.mrf.mxu0 }
0x1b51   :  { %3691 = vmatmul.mubr.msk.f32.vlgmr.msra.gmra.mxu0 %vm70_vm0, %v2949_v14 }
0x1b52   :  { %3699 = vmatpush3.msra.mxu0 %v2953_v6  ;;  %3706 = vmatprep.mubr.msk.f32.mxu0 %vm3830_vm1, %v3829_v34 }
0x1b53   :  { %3700 = vmatprep.subr.mxu0 %v3829_v34 }
0x1b54   :  { %3701 = vmatpush3.msra.mxu0 %v2952_v7 }
0x1b55   :  { %3702 = vmatprep.subr.mxu0 %v3829_v34 }
0x1b56   :  { %3703 = vmatpush3.msra.mxu0 %v2951_v8 }
0x1b57   :  { %3704 = vmatprep.subr.mxu0 %v3829_v34 }
0x1b58   :  { %3705 = vmatpush3.msra.mxu0 %v2950_v9 }
0x1b59   :  { %3707 = vmatmul.mubr.msk.f32.vlgmr.msra.gmra.mxu0 %vm70_vm0, %v3106_v17 }
0x1c11   :  { %v3024_v62 = vpop.f32.mrf.mxu0 }
0x1c12   :  { %v3025_v18 = vadd.f32 %v3024_v62, %v2954_v47 }
0x1c13   :  { %v3692_v19 = vpop.f32.mrf.mxu0 }
0x1c14   :  { %3029 = vst.msk [vmem:[#allocation3] sm:$0x1] %vm3028_vm6, %v3025_v18 }
0x1c19   :  { %v3181_v21 = vpop.f32.mrf.mxu0 }
0x1c1a   :  { %v3182_v22 = vadd.f32 %v3181_v21, %v3111_v20 }
0x1c1b   :  { %v3708_v23 = vpop.f32.mrf.mxu0 }
0x1c1c   :  { %3185 = vst.msk [vmem:[#allocation3 + $0x1] sm:$0x1] %vm3028_vm6, %v3182_v22 }
0x1c23   :  { %v3186_v34 = vld [vmem:[#allocation3] sm:$0x3] }
0x1c24   :  { %v3191_v24 = vand.u32 2147483647, %v3186_v34  ;;  %v3188_v35 = vmax.f32 %v3186_v34, 0.0  ;;  %v3189_v36 = vmul.f32 %v3187_v30, %v3186_v34 }
0x1c26   :  { %v3192_v25 = vsub.f32 0.0, %v3191_v24  ;;  %v3190_v42 = vsub.f32 %v3188_v35, %v3189_v36 }
0x1c28   :  { %v3193_v26 = vmul.f32 1.442695, %v3192_v25 }
0x1c2a   :  { %3780 = vpow2.f32 %v3193_v26 }
0x1c37   :  { %v3781_v27 = vpop.eup %3780 }
0x1c38   :  { %v3195_v28 = vadd.f32 1.0, %v3781_v27  ;;  %v3198_v29 = vmul.f32 -0.5, %v3781_v27  ;;  %v3201_v38 = vand.u32 2147483647, %v3781_v27 }
0x1c3a   :  { %3782 = vlog2.f32 %v3195_v28  ;;  %v3199_v33 = vadd.f32 1.0, %v3198_v29  ;;  %vm3202_vm7 = vcmp.lt.f32.partialorder %v3201_v38, 0.0004427343 }
0x1c3c   :  { %v3200_v41 = vmul.f32 %v3781_v27, %v3199_v33 }
0x1c47   :  { %v3783_v40 = vpop.eup %3782 }
0x1c48   :  { %v3197_v39 = vmul.f32 0.6931472, %v3783_v40 }
0x1c4a   :  { %v3203_v43 = vsel %vm3202_vm7, %v3200_v41, %v3197_v39 }
0x1c4b   :  { %v3204_v44 = vadd.f32 %v3203_v43, %v3190_v42 }
0x1c4d   :  { %v3206_v46 = vsel %vm3205_vm8, %v3204_v44, 0.0 }
0x1c4e   :  { %3207 = vadd.xlane.f32.xlu1 %v3206_v46 }
0x1c4f   :  { %3796 = shalt.err (!%p3793_p4)
}
0x1c50   :  { %3232 = dma.vmem_to_hbm [thread:$0]  %s3230_s3, 32, %s4457_s19, [#allocation4]   ;;  %vm3211_vm9 = vcmask 1041408   ;;  %vm3221_vm10 = vcmask 0  }
0x1c51   :  { %s3837_s8 = smov [#allocation5]  }
0x1c52   :  { %s3239_s27 = sshll.u32 %s3837_s8, 4  ;;  %s3240_s27 = int_to_ptr.vmem [resolvable:$true] %s3239_s27 }
0x1c53   :  { %s3805_s11 = scalar_lea.vmem %s3240_s27, 16  ;;  %s3809_s12 = scalar_lea.vmem %s3240_s27, 32 }
0x1c54   :  { %p3806_p5 = scmp.ne.s32.totalorder %s3240_s27, %s3805_s11  ;;  %p3810_p6 = scmp.lt.s32.totalorder %s3240_s27, %s3240_s27 }
0x1c55   :  { %p3811_p7 = scmp.lt.s32.totalorder %s3809_s12, %s3805_s11 }
0x1c57   :  { %p3812_p8 = por %p3811_p7, %p3810_p6 }
0x1c59   :  { %p3813_p9 = pnand %p3812_p8, %p3806_p5 }
0x1cd7   :  { %v3208_v45 = vpop.xlane.xlu1 %3207 }
0x1cd8   :  { %v3210_v48 = vmul.f32 0.33333334, %v3208_v45 }
0x1cda   :  { %v3212_v60 = vsel %vm3211_vm9, %v3210_v48, 0.0 }
0x1cdb   :  { %v3213_v49 = vrot.slane %v3212_v60, 4 }
0x1cdd   :  { %v3214_v50 = vadd.f32 %v3213_v49, %v3212_v60 }
0x1cdf   :  { %v3215_v51 = vrot.slane %v3214_v50, 2 }
0x1ce1   :  { %v3216_v52 = vadd.f32 %v3215_v51, %v3214_v50 }
0x1ce3   :  { %v3217_v53 = vrot.slane %v3216_v52, 1 }
0x1ce5   :  { %v3218_v54 = vadd.f32 %v3217_v53, %v3216_v52 }
0x1ce7   :  { %v3220_v55 = vmul.f32 0.5, %v3218_v54 }
0x1ce9   :  { %3222 = vst.msk [vmem:[#allocation5] sm:$0x1] %vm3221_vm10, %v3220_v55 }
0x1cea   :  { %3816 = shalt.err (!%p3813_p9)
}
0x1ceb   :  { %3242 = dma.vmem_to_hbm [thread:$0]  %s3240_s27, 16, %s4458_s20, [#allocation6]  }
0x1cec   :  { %3825 = dma.done.wait [#allocation4], 32  }
0x1ced   :  { %3826 = vsyncadd [#allocation4], 4294967264 }
0x1cee   :  { %3827 = dma.done.wait [#allocation6], 16  }
0x1cef   :  { %3828 = vsyncadd [#allocation6], 4294967280 }
0x1cf0   :  { %3249 = vsyncpa [#allocation4], 1 }
0x1cf1   :  { %3250 = vsyncpa [#allocation6], 1 }

</bundles_post_ra>
